<compile_context>
chip_gen: v6e
topology: v6e:2x2x1
jax: 0.10.0
libtpu: 0.0.40
codegen_flags: <defaults>
</compile_context>

<pallas_src>
import functools
import math

import jax
import jax.numpy as jnp
from jax.experimental import pallas as pl
from jax.experimental.pallas import tpu as pltpu


MID_PAD = 128   # mid_dim (32) padded to one full lane tile
LAT_PAD = 128   # latent_dim (16) padded to one full lane tile


def _round_up(n, m):
    return ((n + m - 1) // m) * m


def _pad2d(a, rows, cols, dtype):
    out = jnp.zeros((rows, cols), dtype)
    return out.at[: a.shape[0], : a.shape[1]].set(a.astype(dtype))


# --------------------------------------------------------------------------- kernel
def vae_kernel(x_ref, eps_ref,
               w1_ref, b1_ref, w2_ref, b2_ref,
               w3_ref, b3_ref, w4_ref, b4_ref,
               recon_ref, lat_ref, *, lat_pad, latent_dim):
    f32 = jnp.float32
    bf16 = jnp.bfloat16

    # encode: h1 = relu(fc1(x)) -- bf16 MXU operands, f32 accumulate, f32 elementwise.
    x = x_ref[...].astype(bf16)
    h1 = jnp.maximum(
        jnp.dot(x, w1_ref[...], preferred_element_type=f32) + b1_ref[...], 0.0)

    # fused fc21|fc22: one (MID_PAD, 2*LAT_PAD) matmul; lane-aligned split afterwards.
    s = jnp.dot(h1.astype(bf16), w2_ref[...], preferred_element_type=f32) + b2_ref[...]
    mu = s[:, :lat_pad]        # lanes >= latent_dim are exactly 0 (padded weight cols)
    logvar = s[:, lat_pad:]    # lanes >= latent_dim are exactly 0

    # reparameterize (training semantics); eps padded lanes are 0 -> padded z lanes stay 0.
    z = mu + eps_ref[...] * jnp.exp(0.5 * logvar)

    # decode: h3 = relu(fc3(z)); recon = sigmoid(fc4(h3)).
    h3 = jnp.maximum(
        jnp.dot(z.astype(bf16), w3_ref[...], preferred_element_type=f32) + b3_ref[...], 0.0)
    logits = jnp.dot(h3.astype(bf16), w4_ref[...], preferred_element_type=f32) + b4_ref[...]

    # sigmoid(x) == 0.5*tanh(0.5*x)+0.5: one EUP push per element instead of exp+recip.
    recon_ref[...] = (0.5 * jnp.tanh(0.5 * logits) + 0.5).astype(recon_ref.dtype)

    # Compact latent slab: [mu | logvar | z | 0...] in ONE lane-dense 128-wide block.
    # Lane placement is done with tiny exact 0/1 shift matrices on the MXU (cheap in a
    # mem-bound kernel, unambiguous lowering).  mu/logvar/z are exactly 0 past
    # latent_dim, so the three contributions never overlap.
    row = jax.lax.broadcasted_iota(jnp.int32, (lat_pad, lat_pad), 0)
    col = jax.lax.broadcasted_iota(jnp.int32, (lat_pad, lat_pad), 1)
    sh1 = (col == row + latent_dim).astype(f32)
    sh2 = (col == row + 2 * latent_dim).astype(f32)
    lat_ref[...] = (mu
                    + jnp.dot(logvar, sh1, preferred_element_type=f32)
                    + jnp.dot(z, sh2, preferred_element_type=f32))


# --------------------------------------------------------------------------- params
def init_params(key, input_dim, mid_dim, latent_dim):
    """Logical (torch-equivalent) f32 parameters; weights stored as (in, out)."""
    ks = jax.random.split(key, 10)
    scale = 0.02

    def w(k, shape):
        return (scale * jax.random.normal(k, shape)).astype(jnp.float32)

    def b(k, n):
        return (scale * jax.random.normal(k, (1, n))).astype(jnp.float32)

    return {
        "w1":  w(ks[0], (input_dim, mid_dim)),   "b1":  b(ks[1], mid_dim),
        "w21": w(ks[2], (mid_dim, latent_dim)),  "b21": b(ks[3], latent_dim),
        "w22": w(ks[4], (mid_dim, latent_dim)),  "b22": b(ks[5], latent_dim),
        "w3":  w(ks[6], (latent_dim, mid_dim)),  "b3":  b(ks[7], mid_dim),
        "w4":  w(ks[8], (mid_dim, input_dim)),   "b4":  b(ks[9], input_dim),
    }


def pack_params(p, *, mid_pad=MID_PAD, lat_pad=LAT_PAD):
    """One-time repack: zero-pad to lane-dense shapes, fuse fc21|fc22, cast weights to
    bf16 (biases stay f32 -- they add onto the f32 accumulators)."""
    input_dim, mid = p["w1"].shape
    latent = p["w21"].shape[1]
    in_pad = _round_up(input_dim, 128)

    w2 = jnp.zeros((mid_pad, 2 * lat_pad), jnp.bfloat16)
    w2 = w2.at[:mid, :latent].set(p["w21"].astype(jnp.bfloat16))
    w2 = w2.at[:mid, lat_pad:lat_pad + latent].set(p["w22"].astype(jnp.bfloat16))
    b2 = jnp.zeros((1, 2 * lat_pad), jnp.float32)
    b2 = b2.at[:, :latent].set(p["b21"])
    b2 = b2.at[:, lat_pad:lat_pad + latent].set(p["b22"])

    return {
        "w1": _pad2d(p["w1"], in_pad, mid_pad, jnp.bfloat16),
        "b1": _pad2d(p["b1"], 1, mid_pad, jnp.float32),
        "w2": w2, "b2": b2,
        "w3": _pad2d(p["w3"], lat_pad, mid_pad, jnp.bfloat16),
        "b3": _pad2d(p["b3"], 1, mid_pad, jnp.float32),
        "w4": _pad2d(p["w4"], mid_pad, in_pad, jnp.bfloat16),
        "b4": _pad2d(p["b4"], 1, in_pad, jnp.float32),
    }


# --------------------------------------------------------------------------- wrapper
def vae_forward(x_nchw, eps, packed, *, b_tile=512):
    """x_nchw: (B, C, H, W) f32 or bf16.  eps: (B, latent_dim).  packed: pack_params()."""
    B = x_nchw.shape[0]
    input_dim = int(math.prod(x_nchw.shape[1:]))
    latent_dim = eps.shape[1]
    in_pad, mid_pad = packed["w1"].shape
    lat_pad = packed["w3"].shape[0]
    assert 3 * latent_dim <= lat_pad, "compact [mu|logvar|z] slab needs 3*latent <= 128"

    x_flat = x_nchw.reshape(B, input_dim)          # == x.view(-1, input_dim); no copy
    if in_pad != input_dim:                        # only materializes if not lane-aligned
        x_flat = jnp.zeros((B, in_pad), x_flat.dtype).at[:, :input_dim].set(x_flat)
    # eps in lane-dense layout; padded lanes must be 0 so padded z lanes stay 0 (tiny copy)
    eps_p = jnp.zeros((B, lat_pad), jnp.float32).at[:, :latent_dim].set(
        eps.astype(jnp.float32))

    # Batch tiling: no row padding.  Last grid block may overhang B; Pallas masks the
    # out-of-bounds rows on writeback and the garbage rows are never consumed.
    if B <= 16:
        bt = B                                     # single full-array block
    else:
        bt = min(b_tile, _round_up(B, 16))
        bt = min(bt, _round_up(pl.cdiv(B, 2), 16))  # keep >= 2 grid steps (v7x: 2 TCs)
        bt = max(16, (bt // 16) * 16)
    grid = (pl.cdiv(B, bt),)

    recon_dtype, recon_itemsize = jnp.bfloat16, 2
    x_bytes = x_flat.dtype.itemsize

    def row_spec(cols):
        return pl.BlockSpec((bt, cols), lambda i: (i, 0))

    def resident_spec(arr):
        return pl.BlockSpec(arr.shape, lambda i: (0, 0))   # stays in VMEM across steps

    in_specs = [
        row_spec(in_pad), row_spec(lat_pad),
        resident_spec(packed["w1"]), resident_spec(packed["b1"]),
        resident_spec(packed["w2"]), resident_spec(packed["b2"]),
        resident_spec(packed["w3"]), resident_spec(packed["b3"]),
        resident_spec(packed["w4"]), resident_spec(packed["b4"]),
    ]
    out_specs = (row_spec(in_pad), row_spec(lat_pad))
    out_shape = (
        jax.ShapeDtypeStruct((B, in_pad), recon_dtype),      # recon (bf16)
        jax.ShapeDtypeStruct((B, lat_pad), jnp.float32),     # [mu|logvar|z|0] slab
    )

    weight_bytes = sum(int(v.size) * v.dtype.itemsize for v in packed.values())
    flops = 2 * B * (in_pad * mid_pad + mid_pad * 2 * lat_pad + lat_pad * mid_pad
                     + mid_pad * in_pad + 2 * lat_pad * lat_pad)
    transcendentals = B * (lat_pad + in_pad)                 # exp + tanh(sigmoid)
    bytes_accessed = (B * (in_pad * x_bytes + lat_pad * 4
                           + in_pad * recon_itemsize + lat_pad * 4) + weight_bytes)

    # VMEM budget from actual buffers: double-buffered batch tiles + resident weights
    # (default double-buffered) + scratch headroom; stays well under v7x's 64 MiB.
    tile_bytes = bt * (in_pad * x_bytes + lat_pad * 4 + in_pad * recon_itemsize
                       + lat_pad * 4)
    vmem_limit = min(2 * tile_bytes + 2 * weight_bytes + (8 << 20), 48 << 20)

    recon_p, lat = pl.pallas_call(
        functools.partial(vae_kernel, lat_pad=lat_pad, latent_dim=latent_dim),
        out_shape=out_shape,
        grid=grid,
        in_specs=in_specs,
        out_specs=out_specs,
        compiler_params=pltpu.CompilerParams(
            dimension_semantics=("parallel",),
            vmem_limit_bytes=int(vmem_limit),
        ),
        cost_estimate=pl.CostEstimate(
            flops=int(flops),
            transcendentals=int(transcendentals),
            bytes_accessed=int(bytes_accessed),
        ),
    )(x_flat, eps_p,
      packed["w1"], packed["b1"], packed["w2"], packed["b2"],
      packed["w3"], packed["b3"], packed["w4"], packed["b4"])

    recon = recon_p[:, :input_dim]                       # bf16; cast downstream if needed
    mu = lat[:, :latent_dim]
    logvar = lat[:, latent_dim:2 * latent_dim]
    z = lat[:, 2 * latent_dim:3 * latent_dim]
    return recon, mu, logvar, z


# --------------------------------------------------------------------------- reference
def vae_reference(x_nchw, eps, p):
    """Pure-JAX f32 reference identical to the PyTorch forward (training mode)."""
    B = x_nchw.shape[0]
    x = x_nchw.reshape(B, -1)
    h1 = jnp.maximum(x @ p["w1"] + p["b1"], 0.0)
    mu = h1 @ p["w21"] + p["b21"]
    logvar = h1 @ p["w22"] + p["b22"]
    z = mu + eps * jnp.exp(0.5 * logvar)
    h3 = jnp.maximum(z @ p["w3"] + p["b3"], 0.0)
    recon = jax.nn.sigmoid(h3 @ p["w4"] + p["b4"])
    return recon, mu, logvar, z


if __name__ == "__main__":
    # cfg: N_CHANNELS=4, IMG_SIZE=16 -> input_dim=1024; VAE_MID_DIM=32; EMBEDDING_DIM=16
    B, C, H, W = 2, 4, 16, 16
    MID_DIM, LATENT_DIM = 32, 16
    INPUT_DIM = C * H * W

    key = jax.random.PRNGKey(0)
    k_x, k_eps, k_p = jax.random.split(key, 3)

    x = jax.random.uniform(k_x, (B, C, H, W), dtype=jnp.float32)
    eps = jax.random.normal(k_eps, (B, LATENT_DIM), dtype=jnp.float32)
    params = init_params(k_p, INPUT_DIM, MID_DIM, LATENT_DIM)
    packed = pack_params(params)        # one-time lane-dense + bf16 repack of the weights

    # bf16 input stream (halves the dominant HBM read); reference consumes the same values.
    x_bf16 = x.astype(jnp.bfloat16)

    recon, mu, logvar, z = vae_forward(x_bf16, eps, packed)
    jax.block_until_ready((recon, mu, logvar, z))

    r_recon, r_mu, r_logvar, r_z = vae_reference(x_bf16.astype(jnp.float32), eps, params)
    assert recon.shape == (B, INPUT_DIM)
    assert mu.shape == logvar.shape == z.shape == (B, LATENT_DIM)
    # bf16 matmul path + bf16 recon storage -> looser tolerances than the f32 version.
    assert jnp.allclose(recon.astype(jnp.float32), r_recon, atol=2e-2)
    assert jnp.allclose(mu, r_mu, atol=1e-2)
    assert jnp.allclose(logvar, r_logvar, atol=1e-2)
    assert jnp.allclose(z, r_z, atol=1e-2)

    print("KERNEL_OK")
</pallas_src>

<mosaic_0001>
module attributes {stable_mosaic.version = 11 : i64} {
  func.func @vae_kernel(%arg0: i32, %arg1: memref<2x1024xbf16, #tpu.memory_space<vmem>>, %arg2: memref<2x128xf32, #tpu.memory_space<vmem>>, %arg3: memref<1024x128xbf16, #tpu.memory_space<vmem>>, %arg4: memref<1x128xf32, #tpu.memory_space<vmem>>, %arg5: memref<128x256xbf16, #tpu.memory_space<vmem>>, %arg6: memref<1x256xf32, #tpu.memory_space<vmem>>, %arg7: memref<128x128xbf16, #tpu.memory_space<vmem>>, %arg8: memref<1x128xf32, #tpu.memory_space<vmem>>, %arg9: memref<128x1024xbf16, #tpu.memory_space<vmem>>, %arg10: memref<1x1024xf32, #tpu.memory_space<vmem>>, %arg11: memref<2x1024xbf16, #tpu.memory_space<vmem>>, %arg12: memref<2x128xf32, #tpu.memory_space<vmem>>) attributes {dimension_semantics = [#tpu.dimension_semantics<parallel>], iteration_bounds = array<i64: 1>, scalar_prefetch = 0 : i64, scratch_operands = 0 : i64, tpu.core_type = #tpu.core_type<tc>, window_params = [{transform_indices = @transform_0, window_bounds = array<i64: 2, 1024>}, {transform_indices = @transform_1, window_bounds = array<i64: 2, 128>}, {pipeline_mode = #tpu.pipeline_mode<synchronous>, transform_indices = @transform_2, window_bounds = array<i64: 1024, 128>}, {pipeline_mode = #tpu.pipeline_mode<synchronous>, transform_indices = @transform_3, window_bounds = array<i64: 1, 128>}, {pipeline_mode = #tpu.pipeline_mode<synchronous>, transform_indices = @transform_4, window_bounds = array<i64: 128, 256>}, {pipeline_mode = #tpu.pipeline_mode<synchronous>, transform_indices = @transform_5, window_bounds = array<i64: 1, 256>}, {pipeline_mode = #tpu.pipeline_mode<synchronous>, transform_indices = @transform_6, window_bounds = array<i64: 128, 128>}, {pipeline_mode = #tpu.pipeline_mode<synchronous>, transform_indices = @transform_7, window_bounds = array<i64: 1, 128>}, {pipeline_mode = #tpu.pipeline_mode<synchronous>, transform_indices = @transform_8, window_bounds = array<i64: 128, 1024>}, {pipeline_mode = #tpu.pipeline_mode<synchronous>, transform_indices = @transform_9, window_bounds = array<i64: 1, 1024>}, {transform_indices = @transform_10, window_bounds = array<i64: 2, 1024>}, {transform_indices = @transform_11, window_bounds = array<i64: 2, 128>}]} {
    %c0 = arith.constant 0 : index
    %c0_0 = arith.constant 0 : index
    %0 = vector.load %arg1[%c0, %c0_0] : memref<2x1024xbf16, #tpu.memory_space<vmem>>, vector<2x1024xbf16>
    %c0_1 = arith.constant 0 : index
    %c0_2 = arith.constant 0 : index
    %1 = vector.load %arg3[%c0_1, %c0_2] : memref<1024x128xbf16, #tpu.memory_space<vmem>>, vector<1024x128xbf16>
    %cst = arith.constant dense<0.000000e+00> : vector<2x128xf32>
    %2 = tpu.matmul %0, %1, %cst {dimension_numbers = #tpu.dot_dimension_numbers<[1], [0], [0], [1], [0, 0, 1, 1], [], []>} : vector<2x1024xbf16>, vector<1024x128xbf16>, vector<2x128xf32> -> vector<2x128xf32>
    %c0_3 = arith.constant 0 : index
    %c0_4 = arith.constant 0 : index
    %3 = vector.load %arg4[%c0_3, %c0_4] : memref<1x128xf32, #tpu.memory_space<vmem>>, vector<1x128xf32>
    %4 = vector.broadcast %3 : vector<1x128xf32> to vector<2x128xf32>
    %5 = arith.addf %2, %4 : vector<2x128xf32>
    %cst_5 = arith.constant 0.000000e+00 : f32
    %6 = vector.broadcast %cst_5 : f32 to vector<2x128xf32>
    %7 = arith.maximumf %5, %6 : vector<2x128xf32>
    %8 = arith.truncf %7 : vector<2x128xf32> to vector<2x128xbf16>
    %c0_6 = arith.constant 0 : index
    %c0_7 = arith.constant 0 : index
    %9 = vector.load %arg5[%c0_6, %c0_7] : memref<128x256xbf16, #tpu.memory_space<vmem>>, vector<128x256xbf16>
    %cst_8 = arith.constant dense<0.000000e+00> : vector<2x256xf32>
    %10 = tpu.matmul %8, %9, %cst_8 {dimension_numbers = #tpu.dot_dimension_numbers<[1], [0], [0], [1], [0, 0, 1, 1], [], []>} : vector<2x128xbf16>, vector<128x256xbf16>, vector<2x256xf32> -> vector<2x256xf32>
    %c0_9 = arith.constant 0 : index
    %c0_10 = arith.constant 0 : index
    %11 = vector.load %arg6[%c0_9, %c0_10] : memref<1x256xf32, #tpu.memory_space<vmem>>, vector<1x256xf32>
    %12 = vector.broadcast %11 : vector<1x256xf32> to vector<2x256xf32>
    %13 = arith.addf %10, %12 : vector<2x256xf32>
    %14 = vector.extract_strided_slice %13 {offsets = [0, 0], sizes = [2, 128], strides = [1, 1]} : vector<2x256xf32> to vector<2x128xf32>
    %15 = vector.extract_strided_slice %13 {offsets = [0, 128], sizes = [2, 128], strides = [1, 1]} : vector<2x256xf32> to vector<2x128xf32>
    %c0_11 = arith.constant 0 : index
    %c0_12 = arith.constant 0 : index
    %16 = vector.load %arg2[%c0_11, %c0_12] : memref<2x128xf32, #tpu.memory_space<vmem>>, vector<2x128xf32>
    %cst_13 = arith.constant 5.000000e-01 : f32
    %17 = vector.broadcast %cst_13 : f32 to vector<2x128xf32>
    %18 = arith.mulf %17, %15 : vector<2x128xf32>
    %19 = math.exp %18 : vector<2x128xf32>
    %20 = arith.mulf %16, %19 : vector<2x128xf32>
    %21 = arith.addf %14, %20 : vector<2x128xf32>
    %22 = arith.truncf %21 : vector<2x128xf32> to vector<2x128xbf16>
    %c0_14 = arith.constant 0 : index
    %c0_15 = arith.constant 0 : index
    %23 = vector.load %arg7[%c0_14, %c0_15] : memref<128x128xbf16, #tpu.memory_space<vmem>>, vector<128x128xbf16>
    %cst_16 = arith.constant dense<0.000000e+00> : vector<2x128xf32>
    %24 = tpu.matmul %22, %23, %cst_16 {dimension_numbers = #tpu.dot_dimension_numbers<[1], [0], [0], [1], [0, 0, 1, 1], [], []>} : vector<2x128xbf16>, vector<128x128xbf16>, vector<2x128xf32> -> vector<2x128xf32>
    %c0_17 = arith.constant 0 : index
    %c0_18 = arith.constant 0 : index
    %25 = vector.load %arg8[%c0_17, %c0_18] : memref<1x128xf32, #tpu.memory_space<vmem>>, vector<1x128xf32>
    %26 = vector.broadcast %25 : vector<1x128xf32> to vector<2x128xf32>
    %27 = arith.addf %24, %26 : vector<2x128xf32>
    %cst_19 = arith.constant 0.000000e+00 : f32
    %28 = vector.broadcast %cst_19 : f32 to vector<2x128xf32>
    %29 = arith.maximumf %27, %28 : vector<2x128xf32>
    %30 = arith.truncf %29 : vector<2x128xf32> to vector<2x128xbf16>
    %c0_20 = arith.constant 0 : index
    %c0_21 = arith.constant 0 : index
    %31 = vector.load %arg9[%c0_20, %c0_21] : memref<128x1024xbf16, #tpu.memory_space<vmem>>, vector<128x1024xbf16>
    %cst_22 = arith.constant dense<0.000000e+00> : vector<2x1024xf32>
    %32 = tpu.matmul %30, %31, %cst_22 {dimension_numbers = #tpu.dot_dimension_numbers<[1], [0], [0], [1], [0, 0, 1, 1], [], []>} : vector<2x128xbf16>, vector<128x1024xbf16>, vector<2x1024xf32> -> vector<2x1024xf32>
    %c0_23 = arith.constant 0 : index
    %c0_24 = arith.constant 0 : index
    %33 = vector.load %arg10[%c0_23, %c0_24] : memref<1x1024xf32, #tpu.memory_space<vmem>>, vector<1x1024xf32>
    %34 = vector.broadcast %33 : vector<1x1024xf32> to vector<2x1024xf32>
    %35 = arith.addf %32, %34 : vector<2x1024xf32>
    %cst_25 = arith.constant 5.000000e-01 : f32
    %36 = vector.broadcast %cst_25 : f32 to vector<2x1024xf32>
    %37 = arith.mulf %36, %35 : vector<2x1024xf32>
    %38 = math.tanh %37 : vector<2x1024xf32>
    %cst_26 = arith.constant 5.000000e-01 : f32
    %39 = vector.broadcast %cst_26 : f32 to vector<2x1024xf32>
    %40 = arith.mulf %39, %38 : vector<2x1024xf32>
    %cst_27 = arith.constant 5.000000e-01 : f32
    %41 = vector.broadcast %cst_27 : f32 to vector<2x1024xf32>
    %42 = arith.addf %40, %41 : vector<2x1024xf32>
    %43 = arith.truncf %42 : vector<2x1024xf32> to vector<2x1024xbf16>
    %c0_28 = arith.constant 0 : index
    %c0_29 = arith.constant 0 : index
    %44 = vector.load %arg11[%c0_28, %c0_29] : memref<2x1024xbf16, #tpu.memory_space<vmem>>, vector<2x1024xbf16>
    tpu.vector_store %arg11[%c0_28, %c0_29], %43 {strides = array<i32>} : memref<2x1024xbf16, #tpu.memory_space<vmem>>, vector<2x1024xbf16>,
    %45 = tpu.iota {dimensions = array<i32: 0>} : vector<128x128xi32>
    %46 = tpu.iota {dimensions = array<i32: 1>} : vector<128x128xi32>
    %c16_i32 = arith.constant 16 : i32
    %47 = vector.broadcast %c16_i32 : i32 to vector<128x128xi32>
    %48 = arith.addi %45, %47 : vector<128x128xi32>
    %49 = arith.cmpi eq, %46, %48 : vector<128x128xi32>
    %50 = arith.extui %49 : vector<128x128xi1> to vector<128x128xi32>
    %51 = arith.sitofp %50 : vector<128x128xi32> to vector<128x128xf32>
    %c32_i32 = arith.constant 32 : i32
    %52 = vector.broadcast %c32_i32 : i32 to vector<128x128xi32>
    %53 = arith.addi %45, %52 : vector<128x128xi32>
    %54 = arith.cmpi eq, %46, %53 : vector<128x128xi32>
    %55 = arith.extui %54 : vector<128x128xi1> to vector<128x128xi32>
    %56 = arith.sitofp %55 : vector<128x128xi32> to vector<128x128xf32>
    %cst_30 = arith.constant dense<0.000000e+00> : vector<2x128xf32>
    %57 = tpu.matmul %15, %51, %cst_30 {dimension_numbers = #tpu.dot_dimension_numbers<[1], [0], [0], [1], [0, 0, 1, 1], [], []>} : vector<2x128xf32>, vector<128x128xf32>, vector<2x128xf32> -> vector<2x128xf32>
    %58 = arith.addf %14, %57 : vector<2x128xf32>
    %cst_31 = arith.constant dense<0.000000e+00> : vector<2x128xf32>
    %59 = tpu.matmul %21, %56, %cst_31 {dimension_numbers = #tpu.dot_dimension_numbers<[1], [0], [0], [1], [0, 0, 1, 1], [], []>} : vector<2x128xf32>, vector<128x128xf32>, vector<2x128xf32> -> vector<2x128xf32>
    %60 = arith.addf %58, %59 : vector<2x128xf32>
    %c0_32 = arith.constant 0 : index
    %c0_33 = arith.constant 0 : index
    %61 = vector.load %arg12[%c0_32, %c0_33] : memref<2x128xf32, #tpu.memory_space<vmem>>, vector<2x128xf32>
    tpu.vector_store %arg12[%c0_32, %c0_33], %60 {strides = array<i32>} : memref<2x128xf32, #tpu.memory_space<vmem>>, vector<2x128xf32>,
    return
  }
  func.func @transform_0(%arg0: i32) -> (i32, i32) {
    %c0_i32 = arith.constant 0 : i32
    %c0_i32_0 = arith.constant 0 : i32
    return %arg0, %c0_i32 : i32, i32
  }
  func.func @transform_1(%arg0: i32) -> (i32, i32) {
    %c0_i32 = arith.constant 0 : i32
    %c0_i32_0 = arith.constant 0 : i32
    return %arg0, %c0_i32 : i32, i32
  }
  func.func @transform_2(%arg0: i32) -> (i32, i32) {
    %c0_i32 = arith.constant 0 : i32
    %c0_i32_0 = arith.constant 0 : i32
    %c0_i32_1 = arith.constant 0 : i32
    return %c0_i32, %c0_i32_0 : i32, i32
  }
  func.func @transform_3(%arg0: i32) -> (i32, i32) {
    %c0_i32 = arith.constant 0 : i32
    %c0_i32_0 = arith.constant 0 : i32
    %c0_i32_1 = arith.constant 0 : i32
    return %c0_i32, %c0_i32_0 : i32, i32
  }
  func.func @transform_4(%arg0: i32) -> (i32, i32) {
    %c0_i32 = arith.constant 0 : i32
    %c0_i32_0 = arith.constant 0 : i32
    %c0_i32_1 = arith.constant 0 : i32
    return %c0_i32, %c0_i32_0 : i32, i32
  }
  func.func @transform_5(%arg0: i32) -> (i32, i32) {
    %c0_i32 = arith.constant 0 : i32
    %c0_i32_0 = arith.constant 0 : i32
    %c0_i32_1 = arith.constant 0 : i32
    return %c0_i32, %c0_i32_0 : i32, i32
  }
  func.func @transform_6(%arg0: i32) -> (i32, i32) {
    %c0_i32 = arith.constant 0 : i32
    %c0_i32_0 = arith.constant 0 : i32
    %c0_i32_1 = arith.constant 0 : i32
    return %c0_i32, %c0_i32_0 : i32, i32
  }
  func.func @transform_7(%arg0: i32) -> (i32, i32) {
    %c0_i32 = arith.constant 0 : i32
    %c0_i32_0 = arith.constant 0 : i32
    %c0_i32_1 = arith.constant 0 : i32
    return %c0_i32, %c0_i32_0 : i32, i32
  }
  func.func @transform_8(%arg0: i32) -> (i32, i32) {
    %c0_i32 = arith.constant 0 : i32
    %c0_i32_0 = arith.constant 0 : i32
    %c0_i32_1 = arith.constant 0 : i32
    return %c0_i32, %c0_i32_0 : i32, i32
  }
  func.func @transform_9(%arg0: i32) -> (i32, i32) {
    %c0_i32 = arith.constant 0 : i32
    %c0_i32_0 = arith.constant 0 : i32
    %c0_i32_1 = arith.constant 0 : i32
    return %c0_i32, %c0_i32_0 : i32, i32
  }
  func.func @transform_10(%arg0: i32) -> (i32, i32) {
    %c0_i32 = arith.constant 0 : i32
    %c0_i32_0 = arith.constant 0 : i32
    return %arg0, %c0_i32 : i32, i32
  }
  func.func @transform_11(%arg0: i32) -> (i32, i32) {
    %c0_i32 = arith.constant 0 : i32
    %c0_i32_0 = arith.constant 0 : i32
    return %arg0, %c0_i32 : i32, i32
  }
}

</mosaic_0001>

<bundles_post_ra>
// kernel: tpu_custom_call.1
= control target key start
LH: loop header
LB: loop body
LE: loop exit
PB: predicated region body
PF: predicated region fallthrough
CT: control target
= control target key end

     0   :  { %17 = vsyncpa [#allocation3], 0  ;;  %s3163_s0 = inlined_call_operand.hbm [shape: bf16[2,1024], index: 0, kind: input, shape index: {}]   ;;  %s3164_s1 = inlined_call_operand.hbm [shape: f32[2,128], index: 1, kind: input, shape index: {}]   ;;  %s3165_s2 = inlined_call_operand.hbm [shape: bf16[1024,128], index: 2, kind: input, shape index: {}]   ;;  %s3166_s3 = inlined_call_operand.vmem [shape: f32[1,128], index: 3, kind: input, shape index: {}]   ;;  %s3167_s4 = inlined_call_operand.hbm [shape: bf16[128,256], index: 4, kind: input, shape index: {}]   ;;  %s3168_s5 = inlined_call_operand.vmem [shape: f32[1,256], index: 5, kind: input, shape index: {}]   ;;  %s3169_s6 = inlined_call_operand.hbm [shape: bf16[128,128], index: 6, kind: input, shape index: {}]   ;;  %s3170_s7 = inlined_call_operand.vmem [shape: f32[1,128], index: 7, kind: input, shape index: {}]   ;;  %s3171_s8 = inlined_call_operand.hbm [shape: bf16[128,1024], index: 8, kind: input, shape index: {}]   ;;  %s3172_s9 = inlined_call_operand.vmem [shape: f32[1,1024], index: 9, kind: input, shape index: {}]   ;;  %s3173_s10 = inlined_call_operand.hbm [shape: bf16[2,1024], index: 10, kind: output, shape index: {0}]   ;;  %s3174_s11 = inlined_call_operand.hbm [shape: f32[2,128], index: 11, kind: output, shape index: {1}]  }
   0x1   :  { %18 = vsyncpa [#allocation6], 0 }
   0x2   :  { %19 = vsyncpa [#allocation9], 0 }
   0x3   :  { %20 = vsyncpa [#allocation12], 0 }
   0x4   :  { %21 = vsyncpa [#allocation4], 0 }
   0x5   :  { %22 = vsyncpa [#allocation15], 0  ;;  %s2855_s17 = smov [#allocation5]   ;;  %s2856_s19 = smov [#allocation8]  }
   0x6   :  { %s39_s18 = sshll.u32 %s2855_s17, 4  ;;  %s62_s20 = sshll.u32 %s2856_s19, 4  ;;  %s40_s18 = int_to_ptr.vmem [resolvable:$true] %s39_s18  ;;  %s63_s20 = int_to_ptr.vmem [resolvable:$true] %s62_s20 }
   0x7   :  { %s2691_s21 = scalar_lea.vmem %s40_s18, 32  ;;  %p2696_p1 = scmp.lt.s32.totalorder %s40_s18, %s40_s18 }
   0x8   :  { %p2692_p0 = scmp.ne.s32.totalorder %s40_s18, %s2691_s21  ;;  %p2697_p2 = scmp.lt.s32.totalorder %s2691_s21, %s2691_s21 }
   0xa   :  { %p2698_p3 = por %p2697_p2, %p2696_p1 }
   0xc   :  { %p2699_p4 = pnand %p2698_p3, %p2692_p0 }
   0xe   :  { %2702 = shalt.err (!%p2699_p4)
}
   0xf   :  { %42 = dma.hbm_to_vmem [thread:$0]  %s3164_s1, 32, %s40_s18, [#allocation6]  }
  0x10   :  { %s2711_s24 = scalar_lea.vmem %s63_s20, 2048  ;;  %p2716_p6 = scmp.lt.s32.totalorder %s63_s20, %s63_s20 }
  0x11   :  { %p2712_p5 = scmp.ne.s32.totalorder %s63_s20, %s2711_s24  ;;  %p2717_p7 = scmp.lt.s32.totalorder %s2711_s24, %s2711_s24 }
  0x13   :  { %p2718_p8 = por %p2717_p7, %p2716_p6 }
  0x15   :  { %p2719_p9 = pnand %p2718_p8, %p2712_p5 }
  0x17   :  { %2722 = shalt.err (!%p2719_p9)
}
  0x18   :  { %s2857_s25 = smov 128   ;;  %s2858_s26 = smov 8  }
  0x19   :  { %68 = dma.hbm_to_vmem [thread:$0]  %s3167_s4, 2048, %s63_s20, [#allocation9], %s2857_s25, %s2857_s25, %s2858_s26  }
  0x1a   :  { %s2859_s29 = smov [#allocation2]   ;;  %s2860_s12 = smov [#allocation7]  }
  0x1b   :  { %s29_s30 = sshll.u32 %s2859_s29, 4  ;;  %s48_s13 = sshll.u32 %s2860_s12, 4  ;;  %s30_s30 = int_to_ptr.vmem [resolvable:$true] %s29_s30  ;;  %s49_s13 = int_to_ptr.vmem [resolvable:$true] %s48_s13 }
  0x1c   :  { %s2731_s1 = scalar_lea.vmem %s30_s30, 128  ;;  %p2736_p11 = scmp.lt.s32.totalorder %s30_s30, %s30_s30 }
  0x1d   :  { %p2732_p10 = scmp.ne.s32.totalorder %s30_s30, %s2731_s1  ;;  %p2737_p12 = scmp.lt.s32.totalorder %s2731_s1, %s2731_s1 }
  0x1f   :  { %p2738_p13 = por %p2737_p12, %p2736_p11 }
  0x21   :  { %p2739_p0 = pnand %p2738_p13, %p2732_p10 }
  0x23   :  { %2742 = shalt.err (!%p2739_p0)
}
  0x24   :  { %32 = dma.hbm_to_vmem [thread:$0]  %s3163_s0, 128, %s30_s30, [#allocation3]  }
  0x25   :  { %s2751_s16 = scalar_lea.vmem %s49_s13, 8192  ;;  %p2756_p2 = scmp.lt.s32.totalorder %s49_s13, %s49_s13 }
  0x26   :  { %p2752_p1 = scmp.ne.s32.totalorder %s49_s13, %s2751_s16  ;;  %p2757_p3 = scmp.lt.s32.totalorder %s2751_s16, %s2751_s16 }
  0x28   :  { %p2758_p4 = por %p2757_p3, %p2756_p2 }
  0x2a   :  { %p2759_p5 = pnand %p2758_p4, %p2752_p1 }
  0x2c   :  { %2762 = shalt.err (!%p2759_p5)
}
  0x2d   :  { %s2861_s4 = smov 64   ;;  %s2862_s17 = smov 4  }
  0x2e   :  { %54 = dma.hbm_to_vmem [thread:$0]  %s3165_s2, 8192, %s49_s13, [#allocation6], %s2861_s4, %s2861_s4, %s2862_s17  }
  0x2f   :  { %s2863_s20 = smov [#allocation10]   ;;  %s2864_s22 = smov [#allocation11]  }
  0x30   :  { %s76_s21 = sshll.u32 %s2863_s20, 4  ;;  %s90_s23 = sshll.u32 %s2864_s22, 4  ;;  %s77_s21 = int_to_ptr.vmem [resolvable:$true] %s76_s21  ;;  %s91_s23 = int_to_ptr.vmem [resolvable:$true] %s90_s23 }
  0x31   :  { %s2771_s0 = scalar_lea.vmem %s77_s21, 1024  ;;  %p2776_p7 = scmp.lt.s32.totalorder %s77_s21, %s77_s21 }
  0x32   :  { %p2772_p6 = scmp.ne.s32.totalorder %s77_s21, %s2771_s0  ;;  %p2777_p8 = scmp.lt.s32.totalorder %s2771_s0, %s2771_s0 }
  0x34   :  { %p2778_p9 = por %p2777_p8, %p2776_p7 }
  0x36   :  { %p2779_p10 = pnand %p2778_p9, %p2772_p6 }
  0x38   :  { %2782 = shalt.err (!%p2779_p10)
}
  0x39   :  { %82 = dma.hbm_to_vmem [thread:$0]  %s3169_s6, 1024, %s77_s21, [#allocation9], %s2861_s4, %s2861_s4, %s2862_s17  }
  0x3a   :  { %s2791_s26 = scalar_lea.vmem %s91_s23, 8192  ;;  %p2796_p12 = scmp.lt.s32.totalorder %s91_s23, %s91_s23 }
  0x3b   :  { %p2792_p11 = scmp.ne.s32.totalorder %s91_s23, %s2791_s26  ;;  %p2797_p13 = scmp.lt.s32.totalorder %s2791_s26, %s2791_s26 }
  0x3d   :  { %p2798_p0 = por %p2797_p13, %p2796_p12 }
  0x3f   :  { %p2799_p1 = pnand %p2798_p0, %p2792_p11 }
  0x41   :  { %2802 = shalt.err (!%p2799_p1)
}
  0x42   :  { %s2865_s2 = smov 512   ;;  %s2866_s27 = smov 32  }
  0x43   :  { %96 = dma.hbm_to_vmem [thread:$0]  %s3171_s8, 8192, %s91_s23, [#allocation12], %s2865_s2, %s2865_s2, %s2866_s27  }
  0x44   :  { %2843 = dma.done.wait [#allocation3], 128  }
  0x45   :  { %2844 = vsyncadd [#allocation3], 4294967168 }
  0x46   :  { %2845 = dma.done.wait [#allocation6], 8224  }
  0x47   :  { %2846 = vsyncadd [#allocation6], 4294959072 }
  0x48   :  { %2847 = dma.done.wait [#allocation9], 3072  }
  0x49   :  { %2848 = vsyncadd [#allocation9], 4294964224 }
  0x4a   :  { %2849 = dma.done.wait [#allocation12], 8192  }
  0x4b   :  { %2850 = vsyncadd [#allocation12], 4294959104  ;;  %v2568_v0 = vld [vmem:[#allocation7 + $0x78] sm:$0xff]   ;;  %v2572_v4 = vld [vmem:[#allocation7 + $0x70] sm:$0xff]   ;;  %v2867_v22 = vmov 1966171168   ;;  %v259_v24 = vlaneseq }
  0x4c   :  { %v2569_v1 = vld [vmem:[#allocation7 + $0xf8] sm:$0xff]   ;;  %2346 = vmatprep.subr.bf16.mxu0 %v2568_v0  ;;  %v2573_v5 = vld [vmem:[#allocation7 + $0xf0] sm:$0xff]   ;;  %v2576_v8 = vld [vmem:[#allocation7 + $0x68] sm:$0xff]   ;;  %v257_v23 = vunpack.c.l.s4 %v2867_v22  ;;  %vm2870_vm0 = vmmov 0   ;;  %s2873_s14 = smov [#allocation13]  }
  0x4d   :  { %v2570_v2 = vld [vmem:[#allocation7 + $0x38] sm:$0xff]   ;;  %2368 = vmatprep.subr.bf16.mxu1 %v2569_v1  ;;  %v2574_v6 = vld [vmem:[#allocation7 + $0x30] sm:$0xff]   ;;  %v2577_v9 = vld [vmem:[#allocation7 + $0xe8] sm:$0xff]   ;;  %v2953_v30 = vshrl.u32 %v259_v24, 7  ;;  %s2110_s15 = sshll.u32 %s2873_s14, 4  ;;  %s2111_s15 = int_to_ptr.vmem [resolvable:$true] %s2110_s15 }
  0x4e   :  { %v2571_v3 = vld [vmem:[#allocation7 + $0xb8] sm:$0xff]   ;;  %2347 = vmatpush3.bf16.msra.mxu0 %v2570_v2  ;;  %v2575_v7 = vld [vmem:[#allocation7 + $0xb0] sm:$0xff]   ;;  %v2578_v10 = vld [vmem:[#allocation7 + $0x28] sm:$0xff]   ;;  %v258_v29 = vunpack.c.0.s8 %v257_v23 }
  0x4f   :  { %2369 = vmatpush3.bf16.msra.mxu1 %v2571_v3  ;;  %2348 = vmatprep.subr.bf16.mxu0 %v2572_v4  ;;  %v2579_v11 = vld [vmem:[#allocation7 + $0xa8] sm:$0xff]   ;;  %v2580_v12 = vld [vmem:[#allocation7 + $0x60] sm:$0xff]   ;;  %v2584_v16 = vld [vmem:[#allocation7 + $0x58] sm:$0xff]  }
  0x50   :  { %2370 = vmatprep.subr.bf16.mxu1 %v2573_v5  ;;  %v2581_v13 = vld [vmem:[#allocation7 + $0xe0] sm:$0xff]   ;;  %v2585_v17 = vld [vmem:[#allocation7 + $0xd8] sm:$0xff]   ;;  %v2588_v20 = vld [vmem:[#allocation7 + $0x50] sm:$0xff]   ;;  %v2956_v35 = vsub.s32 %v258_v29, %v2953_v30 }
  0x51   :  { %v2582_v14 = vld [vmem:[#allocation7 + $0x20] sm:$0xff]   ;;  %v2586_v18 = vld [vmem:[#allocation7 + $0x18] sm:$0xff]   ;;  %v2589_v21 = vld [vmem:[#allocation7 + $0xd0] sm:$0xff]  }
  0x52   :  { %2349 = vmatpush3.bf16.msra.mxu0 %v2574_v6  ;;  %v2583_v15 = vld [vmem:[#allocation7 + $0xa0] sm:$0xff]   ;;  %v2587_v19 = vld [vmem:[#allocation7 + $0x98] sm:$0xff]   ;;  %v2590_v25 = vld [vmem:[#allocation7 + $0x10] sm:$0xff]  }
  0x53   :  { %2371 = vmatpush3.bf16.msra.mxu1 %v2575_v7  ;;  %2350 = vmatprep.subr.bf16.mxu0 %v2576_v8  ;;  %v2591_v26 = vld [vmem:[#allocation7 + $0x90] sm:$0xff]   ;;  %v2592_v27 = vld [vmem:[#allocation7 + $0x48] sm:$0xff]   ;;  %v2596_v33 = vld [vmem:[#allocation7 + $0x40] sm:$0xff]  }
  0x54   :  { %2372 = vmatprep.subr.bf16.mxu1 %v2577_v9  ;;  %v2593_v28 = vld [vmem:[#allocation7 + $0xc8] sm:$0xff]   ;;  %v2597_v34 = vld [vmem:[#allocation7 + $0xc0] sm:$0xff]   ;;  %v118_v38 = vld [vmem:[#allocation2] sm:$0xff] }
  0x55   :  { %v2594_v31 = vld [vmem:[#allocation7 + $0x8] sm:$0xff]   ;;  %v2598_v36 = vld [vmem:[#allocation7] sm:$0xff]   ;;  %v255_v39 = vcombine.high %v118_v38, %v118_v38  ;;  %v262_v40 = vrot.slane %v118_v38, %v2956_v35  ;;  %v2601_v41 = vld [vmem:[#allocation7 + $0x178] sm:$0xff]  }
  0x56   :  { %2351 = vmatpush3.bf16.msra.mxu0 %v2578_v10  ;;  %v2595_v32 = vld [vmem:[#allocation7 + $0x88] sm:$0xff]   ;;  %v2599_v37 = vld [vmem:[#allocation7 + $0x80] sm:$0xff]   ;;  %v2602_v42 = vld [vmem:[#allocation7 + $0x1f8] sm:$0xff]  }
  0x57   :  { %2373 = vmatpush3.bf16.msra.mxu1 %v2579_v11  ;;  %2352 = vmatprep.subr.bf16.mxu0 %v2580_v12  ;;  %v270_v43 = vcombine.high %v262_v40, %v262_v40  ;;  %v278_v44 = vrot.slane %v262_v40, %v2956_v35  ;;  %v2961_v45 = vrot.slane %v255_v39, %v2956_v35  ;;  %v2603_v46 = vld [vmem:[#allocation7 + $0x138] sm:$0xff]   ;;  %v2605_v51 = vld [vmem:[#allocation7 + $0x170] sm:$0xff]   ;;  %v2609_v58 = vld [vmem:[#allocation7 + $0x168] sm:$0xff]   ;;  %v2868_v39 = vmov 0  }
  0x58   :  { %2374 = vmatprep.subr.bf16.mxu1 %v2581_v13  ;;  %v2604_v48 = vld [vmem:[#allocation7 + $0x1b8] sm:$0xff]   ;;  %v2606_v53 = vld [vmem:[#allocation7 + $0x1f0] sm:$0xff]   ;;  %v2610_v59 = vld [vmem:[#allocation7 + $0x1e8] sm:$0xff]  }
  0x59   :  { %v292_v47 = vrot.slane %v270_v43, %v2956_v35  ;;  %v271_v49 = vcombine.high %v2961_v45, %v2961_v45  ;;  %v300_v50 = vcombine.high %v278_v44, %v278_v44  ;;  %v2607_v55 = vld [vmem:[#allocation7 + $0x130] sm:$0xff]   ;;  %v2611_v60 = vld [vmem:[#allocation7 + $0x128] sm:$0xff]   ;;  %v2613_v62 = vld [vmem:[#allocation7 + $0x160] sm:$0xff]  }
  0x5a   :  { %2353 = vmatpush3.bf16.msra.mxu0 %v2582_v14  ;;  %v2608_v56 = vld [vmem:[#allocation7 + $0x1b0] sm:$0xff]   ;;  %v2612_v61 = vld [vmem:[#allocation7 + $0x1a8] sm:$0xff]   ;;  %v2614_v63 = vld [vmem:[#allocation7 + $0x1e0] sm:$0xff]  }
  0x5b   :  { %2375 = vmatpush3.bf16.msra.mxu1 %v2583_v15  ;;  %2354 = vmatprep.subr.bf16.mxu0 %v2584_v16  ;;  %v302_v52 = vcombine.high %v292_v47, %v292_v47  ;;  %v299_v54 = vrot.slane %v271_v49, %v2956_v35  ;;  %v2615_v0 = vld [vmem:[#allocation7 + $0x120] sm:$0xff]   ;;  %v2617_v2 = vld [vmem:[#allocation7 + $0x158] sm:$0xff]   ;;  %v2621_v6 = vld [vmem:[#allocation7 + $0x150] sm:$0xff]  }
  0x5c   :  { %2376 = vmatprep.subr.bf16.mxu1 %v2585_v17  ;;  %728 = vmatprep.mubr.bf16.mxu0 %v292_v47  ;;  %v2616_v1 = vld [vmem:[#allocation7 + $0x1a0] sm:$0xff]   ;;  %v2618_v3 = vld [vmem:[#allocation7 + $0x1d8] sm:$0xff]   ;;  %v2622_v7 = vld [vmem:[#allocation7 + $0x1d0] sm:$0xff]  }
  0x5d   :  { %768 = vmatprep.mubr.bf16.mxu1 %v302_v52  ;;  %v303_v57 = vcombine.high %v299_v54, %v299_v54  ;;  %v2619_v4 = vld [vmem:[#allocation7 + $0x118] sm:$0xff]   ;;  %v2623_v8 = vld [vmem:[#allocation7 + $0x110] sm:$0xff]   ;;  %v2625_v10 = vld [vmem:[#allocation7 + $0x148] sm:$0xff]  }
  0x5e   :  { %2355 = vmatpush3.bf16.msra.mxu0 %v2586_v18  ;;  %v2620_v5 = vld [vmem:[#allocation7 + $0x198] sm:$0xff]   ;;  %v2624_v9 = vld [vmem:[#allocation7 + $0x190] sm:$0xff]   ;;  %v2626_v11 = vld [vmem:[#allocation7 + $0x1c8] sm:$0xff]   ;;  %v285_v18 = vrot.slane %v2961_v45, %v2956_v35 }
  0x5f   :  { %2377 = vmatpush3.bf16.msra.mxu1 %v2587_v19  ;;  %2356 = vmatprep.subr.bf16.mxu0 %v2588_v20  ;;  %v2627_v12 = vld [vmem:[#allocation7 + $0x108] sm:$0xff]   ;;  %v2629_v14 = vld [vmem:[#allocation7 + $0x140] sm:$0xff]   ;;  %v2633_v20 = vld [vmem:[#allocation8 + $0x70] ss:$8 sps:$4 sm:$0xff]  }
  0x60   :  { %2378 = vmatprep.subr.bf16.mxu1 %v2589_v21  ;;  %v2628_v13 = vld [vmem:[#allocation7 + $0x188] sm:$0xff]   ;;  %v2630_v15 = vld [vmem:[#allocation7 + $0x1c0] sm:$0xff]   ;;  %v301_v19 = vcombine.high %v285_v18, %v285_v18  ;;  %v2635_v21 = vld [vmem:[#allocation8 + $0x74] ss:$8 sps:$4 sm:$0xff]  }
  0x61   :  { %v2631_v16 = vld [vmem:[#allocation7 + $0x100] sm:$0xff]   ;;  %v2647_v29 = vld [vmem:[#allocation8 + $0x34] ss:$8 sps:$4 sm:$0xff]  }
  0x62   :  { %2357 = vmatpush3.bf16.msra.mxu0 %v2590_v25  ;;  %v2632_v17 = vld [vmem:[#allocation7 + $0x180] sm:$0xff]   ;;  %v2641_v25 = vld [vmem:[#allocation8 + $0x54] ss:$8 sps:$4 sm:$0xff]  }
  0x63   :  { %2379 = vmatpush3.bf16.msra.mxu1 %v2591_v26  ;;  %2358 = vmatprep.subr.bf16.mxu0 %v2592_v27  ;;  %v2638_v22 = vld [vmem:[#allocation8 + $0x64] ss:$8 sps:$4 sm:$0xff]   ;;  %v2636_v23 = vld [vmem:[#allocation8 + $0x60] ss:$8 sps:$4 sm:$0xff]   ;;  %v2639_v26 = vld [vmem:[#allocation8 + $0x50] ss:$8 sps:$4 sm:$0xff]  }
  0x64   :  { %2380 = vmatprep.subr.bf16.mxu1 %v2593_v28  ;;  %v2644_v27 = vld [vmem:[#allocation8 + $0x44] ss:$8 sps:$4 sm:$0xff]   ;;  %v2642_v28 = vld [vmem:[#allocation8 + $0x40] ss:$8 sps:$4 sm:$0xff]   ;;  %v2657_v40 = vld [vmem:[#allocation10 + $0x38] sm:$0xff]  }
  0x65   :  { %v2654_v38 = vld [vmem:[#allocation8] ss:$8 sps:$4 sm:$0xff]  }
  0x66   :  { %2359 = vmatpush3.bf16.msra.mxu0 %v2594_v31  ;;  %v2645_v31 = vld [vmem:[#allocation8 + $0x30] ss:$8 sps:$4 sm:$0xff]  }
  0x67   :  { %2381 = vmatpush3.bf16.msra.mxu1 %v2595_v32  ;;  %2360 = vmatprep.subr.bf16.mxu0 %v2596_v33  ;;  %v2650_v32 = vld [vmem:[#allocation8 + $0x24] ss:$8 sps:$4 sm:$0xff]   ;;  %v2648_v33 = vld [vmem:[#allocation8 + $0x20] ss:$8 sps:$4 sm:$0xff]  }
  0x68   :  { %2382 = vmatprep.subr.bf16.mxu1 %v2597_v34  ;;  %v2653_v34 = vld [vmem:[#allocation8 + $0x14] ss:$8 sps:$4 sm:$0xff]  }
  0x6a   :  { %2361 = vmatpush3.bf16.msra.mxu0 %v2598_v36  ;;  %v2651_v36 = vld [vmem:[#allocation8 + $0x10] ss:$8 sps:$4 sm:$0xff]  }
  0x6b   :  { %2383 = vmatpush3.bf16.msra.mxu1 %v2599_v37  ;;  %2390 = vmatprep.subr.bf16.mxu0 %v2601_v41  ;;  %v2656_v37 = vld [vmem:[#allocation8 + $0x4] ss:$8 sps:$4 sm:$0xff]   ;;  %v2869_v41 = vmov 0.0  }
  0x6c   :  { %2412 = vmatprep.subr.bf16.mxu1 %v2602_v42 }
  0x6d   :  { %729 = vmatmul.mubr.bf16.vlgmr.msra.gmra.mxu0 %v278_v44 }
  0x6e   :  { %2391 = vmatpush3.bf16.msra.mxu0 %v2603_v46  ;;  %769 = vmatmul.mubr.bf16.vlgmr.msra.gmra.mxu1 %v300_v50 }
  0x6f   :  { %2392 = vmatprep.subr.bf16.mxu0 %v2605_v51  ;;  %2413 = vmatpush3.bf16.msra.mxu1 %v2604_v48  ;;  %v2136_v51 = vld [vmem:[%s3166_s3] ss:$0 sm:$0xff] }
  0x70   :  { %808 = vmatprep.mubr.bf16.mxu0 %v299_v54  ;;  %2414 = vmatprep.subr.bf16.mxu1 %v2606_v53 }
  0x71   :  { %848 = vmatprep.mubr.bf16.mxu1 %v303_v57 }
  0x72   :  { %2393 = vmatpush3.bf16.msra.mxu0 %v2607_v55 }
  0x73   :  { %2394 = vmatprep.subr.bf16.mxu0 %v2609_v58  ;;  %2415 = vmatpush3.bf16.msra.mxu1 %v2608_v56 }
  0x74   :  { %2416 = vmatprep.subr.bf16.mxu1 %v2610_v59 }
  0x76   :  { %2395 = vmatpush3.bf16.msra.mxu0 %v2611_v60 }
  0x77   :  { %2396 = vmatprep.subr.bf16.mxu0 %v2613_v62  ;;  %2417 = vmatpush3.bf16.msra.mxu1 %v2612_v61 }
  0x78   :  { %2418 = vmatprep.subr.bf16.mxu1 %v2614_v63 }
  0x7a   :  { %2397 = vmatpush3.bf16.msra.mxu0 %v2615_v0 }
  0x7b   :  { %2398 = vmatprep.subr.bf16.mxu0 %v2617_v2  ;;  %2419 = vmatpush3.bf16.msra.mxu1 %v2616_v1 }
  0x7c   :  { %2420 = vmatprep.subr.bf16.mxu1 %v2618_v3 }
  0x7e   :  { %2399 = vmatpush3.bf16.msra.mxu0 %v2619_v4 }
  0x7f   :  { %2400 = vmatprep.subr.bf16.mxu0 %v2621_v6  ;;  %2421 = vmatpush3.bf16.msra.mxu1 %v2620_v5  ;;  %v2658_v5 = vld [vmem:[#allocation10 + $0x30] sm:$0xff]   ;;  %v2659_v6 = vld [vmem:[#allocation10 + $0x28] sm:$0xff]  }
  0x80   :  { %2422 = vmatprep.subr.bf16.mxu1 %v2622_v7  ;;  %v2660_v7 = vld [vmem:[#allocation10 + $0x20] sm:$0xff]  }
  0x82   :  { %2401 = vmatpush3.bf16.msra.mxu0 %v2623_v8  ;;  %v2661_v8 = vld [vmem:[#allocation10 + $0x18] sm:$0xff]  }
  0x83   :  { %2402 = vmatprep.subr.bf16.mxu0 %v2625_v10  ;;  %2423 = vmatpush3.bf16.msra.mxu1 %v2624_v9  ;;  %v2662_v9 = vld [vmem:[#allocation10 + $0x10] sm:$0xff]   ;;  %v2663_v10 = vld [vmem:[#allocation10 + $0x8] sm:$0xff]  }
  0x84   :  { %2424 = vmatprep.subr.bf16.mxu1 %v2626_v11  ;;  %v2664_v11 = vld [vmem:[#allocation10] sm:$0xff]  }
  0x86   :  { %2403 = vmatpush3.bf16.msra.mxu0 %v2627_v12  ;;  %v1183_v12 = vld [vmem:[#allocation11 + $0x1c0] sm:$0xff] }
  0x87   :  { %2404 = vmatprep.subr.bf16.mxu0 %v2629_v14  ;;  %2425 = vmatpush3.bf16.msra.mxu1 %v2628_v13  ;;  %v1187_v13 = vld [vmem:[#allocation11 + $0x1e0] sm:$0xff]  ;;  %v2984_v14 = vld [vmem:[#allocation11 + $0x1c8] sm:$0xff] }
  0x88   :  { %2426 = vmatprep.subr.bf16.mxu1 %v2630_v15  ;;  %v2282_v15 = vcombine.low %v1183_v12, %v1187_v13 }
  0x8a   :  { %2405 = vmatpush3.bf16.msra.mxu0 %v2631_v16  ;;  %v2283_v16 = vcombine.high %v1183_v12, %v1187_v13 }
  0x8b   :  { %2427 = vmatpush3.bf16.msra.mxu1 %v2632_v17  ;;  %966 = vmatprep.subr.bf16.mxu0 %v2635_v21  ;;  %v2986_v17 = vld [vmem:[#allocation11 + $0x1e8] sm:$0xff] }
  0x8c   :  { %2471 = vmatprep.subr.bf16.mxu1 %v2869_v41  ;;  %v2285_v21 = vcombine.high %v2984_v14, %v2986_v17 }
  0x8d   :  { %809 = vmatmul.mubr.bf16.vlgmr.msra.gmra.mxu0 %v285_v18  ;;  %v1175_v18 = vld [vmem:[#allocation11 + $0x180] sm:$0xff] }
  0x8e   :  { %849 = vmatmul.mubr.bf16.vlgmr.msra.gmra.mxu1 %v301_v19  ;;  %967 = vmatpush1.bf16.msra.mxu0 %v2633_v20  ;;  %v1179_v19 = vld [vmem:[#allocation11 + $0x1a0] sm:$0xff]  ;;  %v2284_v20 = vcombine.low %v2984_v14, %v2986_v17  ;;  %v1148_v14 = vld [vmem:[#allocation11 + $0xa8] sm:$0xff] }
  0x8f   :  { %968 = vmatprep.subr.bf16.mxu0 %v2638_v22  ;;  %998 = vmatprep.mubr.bf16.mxu0 %v2868_v39  ;;  %v2275_v22 = vcombine.high %v1175_v18, %v1179_v19 }
  0x90   :  { %2472 = vmatpush3.bf16.msra.mxu1 %v2657_v40  ;;  %2487 = vmatprep.mubr.msk.bf16.mxu1 %vm2870_vm0, %v2869_v41  ;;  %v1143_v40 = vld [vmem:[#allocation11 + $0x80] sm:$0xff] }
  0x91   :  { %2473 = vmatprep.subr.bf16.mxu1 %v2869_v41 }
  0x92   :  { %969 = vmatpush1.bf16.msra.mxu0 %v2636_v23  ;;  %v2274_v23 = vcombine.low %v1175_v18, %v1179_v19 }
  0x93   :  { %970 = vmatprep.subr.bf16.mxu0 %v2641_v25  ;;  %v1167_v25 = vld [vmem:[#allocation11 + $0x140] sm:$0xff] }
  0x94   :  { %2474 = vmatpush3.bf16.msra.mxu1 %v2658_v5 }
  0x95   :  { %2475 = vmatprep.subr.bf16.mxu1 %v2869_v41 }
  0x96   :  { %971 = vmatpush1.bf16.msra.mxu0 %v2639_v26  ;;  %v1171_v26 = vld [vmem:[#allocation11 + $0x160] sm:$0xff] }
  0x97   :  { %972 = vmatprep.subr.bf16.mxu0 %v2644_v27  ;;  %v2267_v27 = vcombine.high %v1167_v25, %v1171_v26 }
  0x98   :  { %2476 = vmatpush3.bf16.msra.mxu1 %v2659_v6  ;;  %v1168_v6 = vld [vmem:[#allocation11 + $0x148] sm:$0xff] }
  0x99   :  { %2477 = vmatprep.subr.bf16.mxu1 %v2869_v41 }
  0x9a   :  { %973 = vmatpush1.bf16.msra.mxu0 %v2642_v28  ;;  %v2266_v28 = vcombine.low %v1167_v25, %v1171_v26 }
  0x9b   :  { %974 = vmatprep.subr.bf16.mxu0 %v2647_v29  ;;  %v1159_v29 = vld [vmem:[#allocation11 + $0x100] sm:$0xff] }
  0x9c   :  { %2478 = vmatpush3.bf16.msra.mxu1 %v2660_v7  ;;  %v1172_v7 = vld [vmem:[#allocation11 + $0x168] sm:$0xff] }
  0x9d   :  { %2479 = vmatprep.subr.bf16.mxu1 %v2869_v41  ;;  %v2268_v12 = vcombine.low %v1168_v6, %v1172_v7 }
  0x9e   :  { %975 = vmatpush1.bf16.msra.mxu0 %v2645_v31  ;;  %v1163_v31 = vld [vmem:[#allocation11 + $0x120] sm:$0xff] }
  0x9f   :  { %976 = vmatprep.subr.bf16.mxu0 %v2650_v32  ;;  %v2259_v32 = vcombine.high %v1159_v29, %v1163_v31 }
  0xa0   :  { %2480 = vmatpush3.bf16.msra.mxu1 %v2661_v8 }
  0xa1   :  { %2481 = vmatprep.subr.bf16.mxu1 %v2869_v41 }
  0xa2   :  { %977 = vmatpush1.bf16.msra.mxu0 %v2648_v33  ;;  %v2258_v33 = vcombine.low %v1159_v29, %v1163_v31  ;;  %v1131_v29 = vld [vmem:[#allocation11 + $0x20] sm:$0xff]  ;;  %v1128_v31 = vld [vmem:[#allocation11 + $0x8] sm:$0xff] }
  0xa3   :  { %978 = vmatprep.subr.bf16.mxu0 %v2653_v34  ;;  %v1151_v34 = vld [vmem:[#allocation11 + $0xc0] sm:$0xff] }
  0xa4   :  { %2482 = vmatpush3.bf16.msra.mxu1 %v2662_v9  ;;  %v2269_v9 = vcombine.high %v1168_v6, %v1172_v7  ;;  %v1174_v6 = vld [vmem:[#allocation11 + $0x178] sm:$0xff] }
  0xa5   :  { %2483 = vmatprep.subr.bf16.mxu1 %v2869_v41 }
  0xa6   :  { %979 = vmatpush1.bf16.msra.mxu0 %v2651_v36  ;;  %v1155_v36 = vld [vmem:[#allocation11 + $0xe0] sm:$0xff] }
  0xa7   :  { %980 = vmatprep.subr.bf16.mxu0 %v2656_v37  ;;  %v2251_v37 = vcombine.high %v1151_v34, %v1155_v36 }
  0xa8   :  { %2484 = vmatpush3.bf16.msra.mxu1 %v2663_v10  ;;  %v1160_v10 = vld [vmem:[#allocation11 + $0x108] sm:$0xff] }
  0xa9   :  { %2485 = vmatprep.subr.bf16.mxu1 %v2869_v41 }
  0xaa   :  { %981 = vmatpush1.bf16.msra.mxu0 %v2654_v38  ;;  %v2250_v38 = vcombine.low %v1151_v34, %v1155_v36 }
  0xab   :  { %1553 = vmatprep.subr.bf16.mxu0 %v2283_v16  ;;  %v1156_v16 = vld [vmem:[#allocation11 + $0xe8] sm:$0xff] }
  0xac   :  { %2486 = vmatpush3.bf16.msra.mxu1 %v2664_v11  ;;  %v1164_v11 = vld [vmem:[#allocation11 + $0x128] sm:$0xff] }
  0xad   :  { %1594 = vmatprep.subr.bf16.mxu1 %v2285_v21  ;;  %v2261_v13 = vcombine.high %v1160_v10, %v1164_v11  ;;  %v2260_v18 = vcombine.low %v1160_v10, %v1164_v11  ;;  %v1144_v21 = vld [vmem:[#allocation11 + $0x88] sm:$0xff]  ;;  %v1161_v11 = vld [vmem:[#allocation11 + $0x110] sm:$0xff] }
  0xae   :  { %v2244_v25 = vcombine.low %v1144_v21, %v1148_v14 }
 0x12d   :  { %v2362_v42 = vpop.f32.mrf.mxu0 }
 0x12e   :  { %v2384_v43 = vpop.f32.mrf.mxu1 }
 0x12f   :  { %v2363_v44 = vpop.f32.mrf.mxu0 }
 0x130   :  { %v2385_v45 = vpop.f32.mrf.mxu1  ;;  %v2364_v50 = vadd.f32 %v2363_v44, %v2362_v42  ;;  %v1147_v42 = vld [vmem:[#allocation11 + $0xa0] sm:$0xff] }
 0x131   :  { %v2365_v46 = vpop.f32.mrf.mxu0  ;;  %v2386_v53 = vadd.f32 %v2385_v45, %v2384_v43  ;;  %v2243_v43 = vcombine.high %v1143_v40, %v1147_v42  ;;  %v2242_v44 = vcombine.low %v1143_v40, %v1147_v42  ;;  %v1135_v45 = vld [vmem:[#allocation11 + $0x40] sm:$0xff]  ;;  %v1189_v40 = vld [vmem:[#allocation11 + $0x1f0] sm:$0xff]  ;;  %v1186_v42 = vld [vmem:[#allocation11 + $0x1d8] sm:$0xff] }
 0x132   :  { %v2387_v47 = vpop.f32.mrf.mxu1  ;;  %v731_v52 = vadd.f32 %v2364_v50, %v2136_v51  ;;  %v1139_v46 = vld [vmem:[#allocation11 + $0x60] sm:$0xff]  ;;  %v874_v50 = vld [vmem:[%s3168_s5] sm:$0x3] }
 0x133   :  { %v2366_v48 = vpop.f32.mrf.mxu0  ;;  %v2235_v47 = vcombine.high %v1135_v45, %v1139_v46 }
 0x134   :  { %v2388_v49 = vpop.f32.mrf.mxu1  ;;  %v771_v57 = vadd.f32 %v2386_v53, %v731_v52  ;;  %v2234_v48 = vcombine.low %v1135_v45, %v1139_v46  ;;  %v1190_v45 = vld [vmem:[#allocation11 + $0x1f8] sm:$0xff] }
 0x135   :  { %v882_v49 = vsub.s32 1, %v2953_v30  ;;  %v2288_v46 = vcombine.low %v1186_v42, %v1190_v45 }
 0x137   :  { %v883_v51 = vrot.slane %v874_v50, %v882_v49 }
 0x14d   :  { %v2406_v54 = vpop.f32.mrf.mxu0 }
 0x14e   :  { %v2428_v55 = vpop.f32.mrf.mxu1 }
 0x14f   :  { %v2407_v56 = vpop.f32.mrf.mxu0 }
 0x150   :  { %v2408_v58 = vadd.f32 %v2407_v56, %v2406_v54  ;;  %v2429_v59 = vpop.f32.mrf.mxu1 }
 0x151   :  { %v2409_v60 = vpop.f32.mrf.mxu0  ;;  %v2430_v62 = vadd.f32 %v2429_v59, %v2428_v55  ;;  %v878_v59 = vsub.s32 0, %v2953_v30 }
 0x152   :  { %v811_v61 = vadd.f32 %v2408_v58, %v771_v57  ;;  %v2431_v63 = vpop.f32.mrf.mxu1 }
 0x153   :  { %v2410_v0 = vpop.f32.mrf.mxu0  ;;  %v879_v60 = vrot.slane %v874_v50, %v878_v59 }
 0x154   :  { %v851_v1 = vadd.f32 %v2430_v62, %v811_v61  ;;  %v2432_v2 = vpop.f32.mrf.mxu1  ;;  %v1007_v61 = vld [vmem:[#allocation5] sm:$0x3] }
 0x155   :  { %v1180_v2 = vld [vmem:[#allocation11 + $0x1a8] sm:$0xff] }
 0x156   :  { %v856_v3 = vmax.f32 %v851_v1, 0.0  ;;  %v1176_v1 = vld [vmem:[#allocation11 + $0x188] sm:$0xff] }
 0x157   :  { %v2277_v5 = vcombine.high %v1176_v1, %v1180_v2  ;;  %v2276_v8 = vcombine.low %v1176_v1, %v1180_v2  ;;  %v1169_v1 = vld [vmem:[#allocation11 + $0x150] sm:$0xff] }
 0x158   :  { %v857_v4 = vpack.c.bf16 %v856_v3, %v856_v3 }
 0x15a   :  { %999 = vmatmul.mubr.bf16.vlgmr.msra.gmra.mxu0 %v857_v4 }
 0x15b   :  { %1585 = vmatprep.mubr.bf16.mxu0 %v2868_v39  ;;  %1554 = vmatpush1.bf16.msra.mxu0 %v2282_v15  ;;  %v1152_v15 = vld [vmem:[#allocation11 + $0xc8] sm:$0xff] }
 0x15c   :  { %1555 = vmatprep.subr.bf16.mxu0 %v2275_v22  ;;  %v2253_v19 = vcombine.high %v1152_v15, %v1156_v16  ;;  %v2252_v17 = vcombine.low %v1152_v15, %v1156_v16  ;;  %v1136_v22 = vld [vmem:[#allocation11 + $0x48] sm:$0xff]  ;;  %v1166_v15 = vld [vmem:[#allocation11 + $0x138] sm:$0xff] }
 0x15f   :  { %1556 = vmatpush1.bf16.msra.mxu0 %v2274_v23  ;;  %v1140_v23 = vld [vmem:[#allocation11 + $0x68] sm:$0xff] }
 0x160   :  { %1557 = vmatprep.subr.bf16.mxu0 %v2267_v27  ;;  %v2237_v26 = vcombine.high %v1136_v22, %v1140_v23  ;;  %v2236_v27 = vcombine.low %v1136_v22, %v1140_v23  ;;  %v1158_v22 = vld [vmem:[#allocation11 + $0xf8] sm:$0xff] }
 0x163   :  { %1558 = vmatpush1.bf16.msra.mxu0 %v2266_v28  ;;  %v1127_v28 = vld [vmem:[#allocation11] sm:$0xff] }
 0x164   :  { %1559 = vmatprep.subr.bf16.mxu0 %v2259_v32  ;;  %v2227_v32 = vcombine.high %v1127_v28, %v1131_v29  ;;  %v2226_v34 = vcombine.low %v1127_v28, %v1131_v29  ;;  %v1149_v28 = vld [vmem:[#allocation11 + $0xb0] sm:$0xff]  ;;  %v1146_v29 = vld [vmem:[#allocation11 + $0x98] sm:$0xff] }
 0x167   :  { %1560 = vmatpush1.bf16.msra.mxu0 %v2258_v33  ;;  %v1132_v33 = vld [vmem:[#allocation11 + $0x28] sm:$0xff] }
 0x168   :  { %1561 = vmatprep.subr.bf16.mxu0 %v2251_v37  ;;  %v2228_v36 = vcombine.low %v1128_v31, %v1132_v33  ;;  %v2229_v37 = vcombine.high %v1128_v31, %v1132_v33  ;;  %v1150_v31 = vld [vmem:[#allocation11 + $0xb8] sm:$0xff] }
 0x16b   :  { %1562 = vmatpush1.bf16.msra.mxu0 %v2250_v38  ;;  %v1185_v38 = vld [vmem:[#allocation11 + $0x1d0] sm:$0xff] }
 0x16c   :  { %1563 = vmatprep.subr.bf16.mxu0 %v2243_v43  ;;  %v2286_v43 = vcombine.low %v1185_v38, %v1189_v40 }
 0x16f   :  { %1564 = vmatpush1.bf16.msra.mxu0 %v2242_v44  ;;  %v2287_v44 = vcombine.high %v1185_v38, %v1189_v40  ;;  %v1141_v38 = vld [vmem:[#allocation11 + $0x70] sm:$0xff]  ;;  %v1138_v40 = vld [vmem:[#allocation11 + $0x58] sm:$0xff] }
 0x170   :  { %1565 = vmatprep.subr.bf16.mxu0 %v2235_v47  ;;  %v2289_v47 = vcombine.high %v1186_v42, %v1190_v45  ;;  %v1142_v42 = vld [vmem:[#allocation11 + $0x78] sm:$0xff] }
 0x173   :  { %1566 = vmatpush1.bf16.msra.mxu0 %v2234_v48  ;;  %v2217_v48 = vld [vmem:[%s3170_s7] ss:$0 sm:$0xff] }
 0x174   :  { %1567 = vmatprep.subr.bf16.mxu0 %v2227_v32 }
 0x177   :  { %1568 = vmatpush1.bf16.msra.mxu0 %v2226_v34 }
 0x178   :  { %1635 = vmatprep.subr.bf16.mxu0 %v2287_v44  ;;  %v2248_v44 = vcombine.low %v1146_v29, %v1150_v31 }
 0x21a   :  { %v1000_v52 = vpop.f32.mrf.mxu0 }
 0x21b   :  { %v3004_v63 = vadd.f32 %v1000_v52, %v879_v60  ;;  %v1177_v52 = vld [vmem:[#allocation11 + $0x190] sm:$0xff] }
 0x21c   :  { %v1002_v53 = vpop.f32.mrf.mxu0 }
 0x21d   :  { %v2998_v54 = vadd.f32 %v1002_v53, %v883_v51 }
 0x21e   :  { %v1004_v55 = vpop.f32.mrf.mxu0 }
 0x21f   :  { %v1008_v56 = vmul.f32 0.5, %v2998_v54  ;;  %v1181_v55 = vld [vmem:[#allocation11 + $0x1b0] sm:$0xff] }
 0x220   :  { %v1005_v57 = vpop.f32.mrf.mxu0  ;;  %v2278_v7 = vcombine.low %v1177_v52, %v1181_v55 }
 0x221   :  { %v1009_v58 = vmul.f32 1.442695, %v1008_v56  ;;  %v1178_v56 = vld [vmem:[#allocation11 + $0x198] sm:$0xff] }
 0x222   :  { %v1182_v57 = vld [vmem:[#allocation11 + $0x1b8] sm:$0xff] }
 0x223   :  { %2665 = vpow2.f32 %v1009_v58 }
 0x230   :  { %v2666_v62 = vpop.eup %2665 }
 0x231   :  { %v1011_v0 = vmul.f32 %v2666_v62, %v1007_v61  ;;  %v2279_v62 = vcombine.high %v1177_v52, %v1181_v55 }
 0x233   :  { %v3007_v3 = vadd.f32 %v1011_v0, %v3004_v63  ;;  %v2281_v0 = vcombine.high %v1178_v56, %v1182_v57 }
 0x235   :  { %v1013_v4 = vpack.c.bf16 %v3007_v3, %v3007_v3 }
 0x237   :  { %2488 = vmatmul.mubr.bf16.vlgmr.msra.gmra.mxu1 %v1013_v4  ;;  %v1173_v4 = vld [vmem:[#allocation11 + $0x170] sm:$0xff] }
 0x238   :  { %1595 = vmatpush1.bf16.msra.mxu1 %v2284_v20  ;;  %1626 = vmatprep.mubr.bf16.mxu1 %v2868_v39  ;;  %v2245_v20 = vcombine.high %v1144_v21, %v1148_v14  ;;  %v2270_v16 = vcombine.low %v1169_v1, %v1173_v4  ;;  %v1153_v14 = vld [vmem:[#allocation11 + $0xd0] sm:$0xff] }
 0x239   :  { %1596 = vmatprep.subr.bf16.mxu1 %v2277_v5  ;;  %v1170_v5 = vld [vmem:[#allocation11 + $0x158] sm:$0xff] }
 0x23a   :  { %v2273_v10 = vcombine.high %v1170_v5, %v1174_v6 }
 0x23c   :  { %1597 = vmatpush1.bf16.msra.mxu1 %v2276_v8  ;;  %v2280_v8 = vcombine.low %v1178_v56, %v1182_v57  ;;  %v1830_v57 = vadd.s32 104, %v2953_v30 }
 0x23d   :  { %1598 = vmatprep.subr.bf16.mxu1 %v2269_v9  ;;  %v2271_v9 = vcombine.high %v1169_v1, %v1173_v4 }
 0x23e   :  { %v1847_v4 = vadd.s32 16, %v1830_v57 }
 0x240   :  { %1599 = vmatpush1.bf16.msra.mxu1 %v2268_v12  ;;  %v1165_v12 = vld [vmem:[#allocation11 + $0x130] sm:$0xff] }
 0x241   :  { %1600 = vmatprep.subr.bf16.mxu1 %v2261_v13  ;;  %v1162_v13 = vld [vmem:[#allocation11 + $0x118] sm:$0xff]  ;;  %v2262_v23 = vcombine.low %v1161_v11, %v1165_v12 }
 0x242   :  { %v2265_v21 = vcombine.high %v1162_v13, %v1166_v15 }
 0x244   :  { %1601 = vmatpush1.bf16.msra.mxu1 %v2260_v18  ;;  %v2272_v18 = vcombine.low %v1170_v5, %v1174_v6  ;;  %v1826_v6 = vadd.s32 72, %v2953_v30 }
 0x245   :  { %1602 = vmatprep.subr.bf16.mxu1 %v2253_v19  ;;  %v2263_v19 = vcombine.high %v1161_v11, %v1165_v12  ;;  %v1824_v11 = vadd.s32 56, %v2953_v30 }
 0x248   :  { %1603 = vmatpush1.bf16.msra.mxu1 %v2252_v17  ;;  %v1157_v17 = vld [vmem:[#allocation11 + $0xf0] sm:$0xff] }
 0x249   :  { %1604 = vmatprep.subr.bf16.mxu1 %v2245_v20  ;;  %v1154_v20 = vld [vmem:[#allocation11 + $0xd8] sm:$0xff]  ;;  %v2254_v32 = vcombine.low %v1153_v14, %v1157_v17 }
 0x24a   :  { %v2256_v33 = vcombine.low %v1154_v20, %v1158_v22 }
 0x24c   :  { %1605 = vmatpush1.bf16.msra.mxu1 %v2244_v25  ;;  %v2264_v25 = vcombine.low %v1162_v13, %v1166_v15  ;;  %v1823_v15 = vadd.s32 48, %v2953_v30 }
 0x24d   :  { %1606 = vmatprep.subr.bf16.mxu1 %v2237_v26  ;;  %v2255_v26 = vcombine.high %v1153_v14, %v1157_v17  ;;  %v3059_v17 = vadd.s32 32, %v2953_v30 }
 0x24e   :  { %v1903_v14 = vadd.s32 32, %v1823_v15 }
 0x250   :  { %1607 = vmatpush1.bf16.msra.mxu1 %v2236_v27  ;;  %v1145_v27 = vld [vmem:[#allocation11 + $0x90] sm:$0xff] }
 0x251   :  { %1608 = vmatprep.subr.bf16.mxu1 %v2229_v37  ;;  %v2247_v34 = vcombine.high %v1145_v27, %v1149_v28  ;;  %v1137_v37 = vld [vmem:[#allocation11 + $0x50] sm:$0xff] }
 0x252   :  { %v2239_v45 = vcombine.high %v1137_v37, %v1141_v38  ;;  %v2238_v52 = vcombine.low %v1137_v37, %v1141_v38 }
 0x254   :  { %1609 = vmatpush1.bf16.msra.mxu1 %v2228_v36  ;;  %v2249_v36 = vcombine.high %v1146_v29, %v1150_v31  ;;  %v1818_v29 = vadd.s32 8, %v2953_v30  ;;  %v1838_v31 = vadd.s32 16, %v3059_v17 }
 0x255   :  { %1676 = vmatprep.subr.bf16.mxu1 %v2289_v47  ;;  %v1129_v47 = vld [vmem:[#allocation11 + $0x10] sm:$0xff] }
 0x256   :  { %v1835_v37 = vadd.s32 16, %v1818_v29 }
 0x2f7   :  { %v1119_v50 = vpop.f32.mrf.mxu1 }
 0x2f8   :  { %v1120_v51 = vadd.f32 %v2217_v48, %v1119_v50  ;;  %v1133_v48 = vld [vmem:[#allocation11 + $0x30] sm:$0xff]  ;;  %v1130_v50 = vld [vmem:[#allocation11 + $0x18] sm:$0xff] }
 0x2f9   :  { %v2489_v53 = vpop.f32.mrf.mxu1  ;;  %v2231_v55 = vcombine.high %v1129_v47, %v1133_v48 }
 0x2fa   :  { %v1125_v58 = vmax.f32 %v1120_v51, 0.0  ;;  %v1134_v51 = vld [vmem:[#allocation11 + $0x38] sm:$0xff]  ;;  %v2240_v53 = vcombine.low %v1138_v40, %v1142_v42 }
 0x2fb   :  { %v1122_v60 = vpop.f32.mrf.mxu1  ;;  %v2233_v56 = vcombine.high %v1130_v50, %v1134_v51  ;;  %v2232_v1 = vcombine.low %v1130_v50, %v1134_v51 }
 0x2fc   :  { %v3018_v61 = vpack.c.bf16 %v1125_v58, %v1125_v58  ;;  %v1828_v58 = vadd.s32 88, %v2953_v30  ;;  %v1829_v60 = vadd.s32 96, %v2953_v30 }
 0x2fd   :  { %v2490_v2 = vpop.f32.mrf.mxu1 }
 0x2fe   :  { %1586 = vmatmul.mubr.bf16.vlgmr.msra.gmra.mxu0 %v3018_v61  ;;  %1627 = vmatmul.mubr.bf16.vlgmr.msra.gmra.mxu1 %v3018_v61  ;;  %v3029_v2 = vand.u32 127, %v259_v24  ;;  %v1908_v5 = vadd.s32 32, %v1828_v58  ;;  %v1906_v24 = vadd.s32 32, %v1826_v6 }
 0x2ff   :  { %1636 = vmatpush1.bf16.msra.mxu0 %v2286_v43  ;;  %1677 = vmatpush1.bf16.msra.mxu1 %v2288_v46  ;;  %v2246_v43 = vcombine.low %v1145_v27, %v1149_v28  ;;  %v2241_v46 = vcombine.high %v1138_v40, %v1142_v42 }
 0x300   :  { %1637 = vmatprep.subr.bf16.mxu0 %v2279_v62  ;;  %1678 = vmatprep.subr.bf16.mxu1 %v2281_v0  ;;  %v1827_v62 = vadd.s32 80, %v2953_v30  ;;  %v2230_v0 = vcombine.low %v1129_v47, %v1133_v48  ;;  %vm1863_vm1 = vcmp.eq.s32.totalorder %v3029_v2, %v1847_v4  ;;  %vm1924_vm2 = vcmp.eq.s32.totalorder %v3029_v2, %v1908_v5  ;;  %v1191_v48 = vld [vmem:[%s3172_s9] sm:$0xff]  ;;  %s2872_s9 = smov [#allocation14]  }
 0x301   :  { %1667 = vmatprep.mubr.bf16.mxu0 %v2868_v39  ;;  %1708 = vmatprep.mubr.bf16.mxu1 %v2868_v39  ;;  %v2257_v39 = vcombine.high %v1154_v20, %v1158_v22  ;;  %vm1922_vm6 = vcmp.eq.s32.totalorder %v3029_v2, %v1906_v24  ;;  %v1841_v20 = vadd.s32 16, %v1824_v11  ;;  %vm1919_vm12 = vcmp.eq.s32.totalorder %v3029_v2, %v1903_v14  ;;  %s2120_s1 = sshll.u32 %s2872_s9, 4  ;;  %s2121_s1 = int_to_ptr.vmem [resolvable:$true] %s2120_s1 }
 0x302   :  { %v1844_v12 = vadd.s32 16, %v1827_v62  ;;  %v1200_v50 = vrot.slane %v1191_v48, %v882_v49  ;;  %v1196_v51 = vrot.slane %v1191_v48, %v878_v59  ;;  %v1215_v49 = vsub.s32 5, %v2953_v30  ;;  %s2803_s16 = scalar_lea.vmem %s2121_s1, 32  ;;  %p2808_p3 = scmp.lt.s32.totalorder %s2121_s1, %s2121_s1 }
 0x303   :  { %1638 = vmatpush1.bf16.msra.mxu0 %v2278_v7  ;;  %1679 = vmatpush1.bf16.msra.mxu1 %v2280_v8  ;;  %v1846_v7 = vadd.s32 16, %v1829_v60  ;;  %v1907_v8 = vadd.s32 32, %v1827_v62  ;;  %vm1857_vm13 = vcmp.eq.s32.totalorder %v3029_v2, %v1841_v20  ;;  %v1223_v4 = vsub.s32 7, %v2953_v30  ;;  %p2804_p2 = scmp.ne.s32.totalorder %s2121_s1, %s2803_s16  ;;  %p2809_p4 = scmp.lt.s32.totalorder %s2803_s16, %s2803_s16 }
 0x304   :  { %1639 = vmatprep.subr.bf16.mxu0 %v2271_v9  ;;  %1680 = vmatprep.subr.bf16.mxu1 %v2273_v10  ;;  %v1825_v9 = vadd.s32 64, %v2953_v30  ;;  %v1845_v10 = vadd.s32 16, %v1828_v58  ;;  %vm1860_vm7 = vcmp.eq.s32.totalorder %v3029_v2, %v1844_v12 }
 0x305   :  { %vm1862_vm3 = vcmp.eq.s32.totalorder %v3029_v2, %v1846_v7  ;;  %vm1923_vm4 = vcmp.eq.s32.totalorder %v3029_v2, %v1907_v8  ;;  %v1224_v7 = vrot.slane %v1191_v48, %v1223_v4  ;;  %p2810_p5 = por %p2809_p4, %p2808_p3 }
 0x306   :  { %v1905_v13 = vadd.s32 32, %v1825_v9  ;;  %vm1861_vm5 = vcmp.eq.s32.totalorder %v3029_v2, %v1845_v10 }
 0x307   :  { %1640 = vmatpush1.bf16.msra.mxu0 %v2270_v16  ;;  %1681 = vmatpush1.bf16.msra.mxu1 %v2272_v18  ;;  %v2871_v16 = vmov 1.0   ;;  %v1904_v18 = vadd.s32 32, %v1824_v11  ;;  %p2811_p6 = pnand %p2810_p5, %p2804_p2 }
 0x308   :  { %1641 = vmatprep.subr.bf16.mxu0 %v2263_v19  ;;  %1682 = vmatprep.subr.bf16.mxu1 %v2265_v21  ;;  %v1822_v19 = vadd.s32 40, %v2953_v30  ;;  %v1842_v21 = vadd.s32 16, %v1825_v9  ;;  %vm1921_vm8 = vcmp.eq.s32.totalorder %v3029_v2, %v1905_v13 }
 0x309   :  { %vm1920_vm10 = vcmp.eq.s32.totalorder %v3029_v2, %v1904_v18 }
 0x30a   :  { %v1902_v22 = vadd.s32 32, %v1822_v19  ;;  %vm1858_vm11 = vcmp.eq.s32.totalorder %v3029_v2, %v1842_v21  ;;  %v1839_v27 = vadd.s32 16, %v1822_v19 }
 0x30b   :  { %1642 = vmatpush1.bf16.msra.mxu0 %v2262_v23  ;;  %1683 = vmatpush1.bf16.msra.mxu1 %v2264_v25  ;;  %v1820_v23 = vadd.s32 24, %v2953_v30  ;;  %v1840_v25 = vadd.s32 16, %v1823_v15 }
 0x30c   :  { %1643 = vmatprep.subr.bf16.mxu0 %v2255_v26  ;;  %1684 = vmatprep.subr.bf16.mxu1 %v2257_v39  ;;  %v1901_v26 = vadd.s32 32, %v3059_v17  ;;  %v1819_v39 = vadd.s32 16, %v2953_v30  ;;  %vm1918_vm14 = vcmp.eq.s32.totalorder %v3029_v2, %v1902_v22 }
 0x30d   :  { %v1900_v28 = vadd.s32 32, %v1820_v23  ;;  %vm1856_vm15 = vcmp.eq.s32.totalorder %v3029_v2, %v1840_v25 }
 0x30f   :  { %1644 = vmatpush1.bf16.msra.mxu0 %v2254_v32  ;;  %1685 = vmatpush1.bf16.msra.mxu1 %v2256_v33  ;;  %v1899_v32 = vadd.s32 32, %v1819_v39  ;;  %v1837_v33 = vadd.s32 16, %v1820_v23 }
 0x310   :  { %1645 = vmatprep.subr.bf16.mxu0 %v2247_v34  ;;  %1686 = vmatprep.subr.bf16.mxu1 %v2249_v36  ;;  %v1898_v34 = vadd.s32 32, %v1818_v29  ;;  %v1836_v36 = vadd.s32 16, %v1819_v39 }
 0x313   :  { %1646 = vmatpush1.bf16.msra.mxu0 %v2246_v43  ;;  %1687 = vmatpush1.bf16.msra.mxu1 %v2248_v44 }
 0x314   :  { %1647 = vmatprep.subr.bf16.mxu0 %v2239_v45  ;;  %1688 = vmatprep.subr.bf16.mxu1 %v2241_v46 }
 0x317   :  { %1648 = vmatpush1.bf16.msra.mxu0 %v2238_v52  ;;  %1689 = vmatpush1.bf16.msra.mxu1 %v2240_v53 }
 0x318   :  { %1649 = vmatprep.subr.bf16.mxu0 %v2231_v55  ;;  %1690 = vmatprep.subr.bf16.mxu1 %v2233_v56 }
 0x31b   :  { %1650 = vmatpush1.bf16.msra.mxu0 %v2230_v0  ;;  %1691 = vmatpush1.bf16.msra.mxu1 %v2232_v1  ;;  %v1211_v0 = vsub.s32 4, %v2953_v30  ;;  %v1219_v1 = vsub.s32 6, %v2953_v30 }
 0x31c   :  { %2491 = vmatprep.subr.mxu0 %v2869_v41  ;;  %2522 = vmatprep.subr.mxu1 %v2869_v41 }
 0x31d   :  { %v1212_v59 = vrot.slane %v1191_v48, %v1211_v0  ;;  %v1220_v5 = vrot.slane %v1191_v48, %v1219_v1 }
 0x31e   :  { %1668 = vmatmul.mubr.bf16.vlgmr.msra.gmra.mxu0 %v3018_v61  ;;  %1709 = vmatmul.mubr.bf16.vlgmr.msra.gmra.mxu1 %v3018_v61  ;;  %v1843_v61 = vadd.s32 16, %v1826_v6  ;;  %v1216_v6 = vrot.slane %v1191_v48, %v1215_v49 }
 0x31f   :  { %2492 = vmatpush3.msk.msra.mxu0 %vm1863_vm1, %v2871_v16  ;;  %2523 = vmatpush3.msk.msra.mxu1 %vm1924_vm2, %v2871_v16  ;;  %vm1917_vm1 = vcmp.eq.s32.totalorder %v3029_v2, %v1901_v26  ;;  %vm1855_vm2 = vcmp.eq.s32.totalorder %v3029_v2, %v1839_v27 }
 0x320   :  { %2493 = vmatprep.subr.mxu0 %v2869_v41  ;;  %2524 = vmatprep.subr.mxu1 %v2869_v41  ;;  %vm1859_vm9 = vcmp.eq.s32.totalorder %v3029_v2, %v1843_v61 }
 0x321   :  { %2494 = vmatpush3.msk.msra.mxu0 %vm1862_vm3, %v2871_v16  ;;  %2525 = vmatpush3.msk.msra.mxu1 %vm1923_vm4, %v2871_v16  ;;  %vm1916_vm3 = vcmp.eq.s32.totalorder %v3029_v2, %v1900_v28  ;;  %vm1854_vm4 = vcmp.eq.s32.totalorder %v3029_v2, %v1838_v31 }
 0x322   :  { %2495 = vmatprep.subr.mxu0 %v2869_v41  ;;  %2526 = vmatprep.subr.mxu1 %v2869_v41 }
 0x323   :  { %2496 = vmatpush3.msk.msra.mxu0 %vm1861_vm5, %v2871_v16  ;;  %2527 = vmatpush3.msk.msra.mxu1 %vm1922_vm6, %v2871_v16  ;;  %vm1915_vm5 = vcmp.eq.s32.totalorder %v3029_v2, %v1899_v32  ;;  %vm1853_vm6 = vcmp.eq.s32.totalorder %v3029_v2, %v1837_v33 }
 0x324   :  { %2497 = vmatprep.subr.mxu0 %v2869_v41  ;;  %2528 = vmatprep.subr.mxu1 %v2869_v41 }
 0x325   :  { %2498 = vmatpush3.msk.msra.mxu0 %vm1860_vm7, %v2871_v16  ;;  %2529 = vmatpush3.msk.msra.mxu1 %vm1921_vm8, %v2871_v16  ;;  %vm1914_vm7 = vcmp.eq.s32.totalorder %v3029_v2, %v1898_v34  ;;  %vm1852_vm8 = vcmp.eq.s32.totalorder %v3029_v2, %v1836_v36 }
 0x326   :  { %2499 = vmatprep.subr.mxu0 %v2869_v41  ;;  %2530 = vmatprep.subr.mxu1 %v2869_v41 }
 0x327   :  { %2500 = vmatpush3.msk.msra.mxu0 %vm1859_vm9, %v2871_v16  ;;  %2531 = vmatpush3.msk.msra.mxu1 %vm1920_vm10, %v2871_v16  ;;  %vm1913_vm9 = vcmp.eq.s32.totalorder %v3029_v2, %v3059_v17  ;;  %vm1851_vm10 = vcmp.eq.s32.totalorder %v3029_v2, %v1835_v37 }
 0x328   :  { %2501 = vmatprep.subr.mxu0 %v2869_v41  ;;  %2532 = vmatprep.subr.mxu1 %v2869_v41 }
 0x329   :  { %2502 = vmatpush3.msk.msra.mxu0 %vm1858_vm11, %v2871_v16  ;;  %2533 = vmatpush3.msk.msra.mxu1 %vm1919_vm12, %v2871_v16  ;;  %vm1850_vm11 = vcmp.eq.s32.totalorder %v3029_v2, %v1819_v39 }
 0x32a   :  { %2503 = vmatprep.subr.mxu0 %v2869_v41  ;;  %2534 = vmatprep.subr.mxu1 %v2869_v41 }
 0x32b   :  { %2504 = vmatpush3.msk.msra.mxu0 %vm1857_vm13, %v2871_v16  ;;  %2535 = vmatpush3.msk.msra.mxu1 %vm1918_vm14, %v2871_v16 }
 0x32c   :  { %2505 = vmatprep.subr.mxu0 %v2869_v41  ;;  %2536 = vmatprep.subr.mxu1 %v2869_v41 }
 0x32d   :  { %2506 = vmatpush3.msk.msra.mxu0 %vm1856_vm15, %v2871_v16  ;;  %2537 = vmatpush3.msk.msra.mxu1 %vm1917_vm1, %v2871_v16 }
 0x32e   :  { %2507 = vmatprep.subr.mxu0 %v2869_v41  ;;  %2538 = vmatprep.subr.mxu1 %v2869_v41 }
 0x32f   :  { %2508 = vmatpush3.msk.msra.mxu0 %vm1855_vm2, %v2871_v16  ;;  %2539 = vmatpush3.msk.msra.mxu1 %vm1916_vm3, %v2871_v16 }
 0x330   :  { %2509 = vmatprep.subr.mxu0 %v2869_v41  ;;  %2540 = vmatprep.subr.mxu1 %v2869_v41 }
 0x331   :  { %2510 = vmatpush3.msk.msra.mxu0 %vm1854_vm4, %v2871_v16  ;;  %2541 = vmatpush3.msk.msra.mxu1 %vm1915_vm5, %v2871_v16 }
 0x332   :  { %2511 = vmatprep.subr.mxu0 %v2869_v41  ;;  %2542 = vmatprep.subr.mxu1 %v2869_v41 }
 0x333   :  { %2512 = vmatpush3.msk.msra.mxu0 %vm1853_vm6, %v2871_v16  ;;  %2543 = vmatpush3.msk.msra.mxu1 %vm1914_vm7, %v2871_v16 }
 0x334   :  { %2513 = vmatprep.subr.mxu0 %v2869_v41  ;;  %2544 = vmatprep.subr.mxu1 %v2869_v41 }
 0x335   :  { %2514 = vmatpush3.msk.msra.mxu0 %vm1852_vm8, %v2871_v16  ;;  %2545 = vmatpush3.msk.msra.mxu1 %vm1913_vm9, %v2871_v16 }
 0x336   :  { %2546 = vmatprep.mubr.msk.f32.mxu1 %vm2870_vm0, %v2869_v41  ;;  %2515 = vmatprep.subr.mxu0 %v2869_v41 }
 0x337   :  { %2547 = vmatmul.mubr.f32.vlgmr.msra.gmra.mxu1 %v3007_v3  ;;  %2516 = vmatpush3.msk.msra.mxu0 %vm1851_vm10, %v2871_v16  ;;  %v1207_v3 = vsub.s32 3, %v2953_v30 }
 0x338   :  { %2517 = vmatprep.subr.mxu0 %v2869_v41  ;;  %2519 = vmatprep.mubr.msk.f32.mxu0 %vm2870_vm0, %v2869_v41  ;;  %v1203_v41 = vsub.s32 2, %v2953_v30 }
 0x339   :  { %2518 = vmatpush3.msk.msra.mxu0 %vm1850_vm11, %v2871_v16 }
 0x33a   :  { %2520 = vmatmul.mubr.f32.vlgmr.msra.gmra.mxu0 %v2998_v54  ;;  %v1208_v54 = vrot.slane %v1191_v48, %v1207_v3  ;;  %v1204_v52 = vrot.slane %v1191_v48, %v1203_v41 }
 0x3be   :  { %v1587_v38 = vpop.f32.mrf.mxu0  ;;  %v1628_v40 = vpop.f32.mrf.mxu1 }
 0x3bf   :  { %v1588_v56 = vadd.f32 %v1587_v38, %v1196_v51  ;;  %v1629_v57 = vadd.f32 %v1628_v40, %v1204_v52 }
 0x3c0   :  { %v1589_v42 = vpop.f32.mrf.mxu0  ;;  %v1630_v43 = vpop.f32.mrf.mxu1 }
 0x3c1   :  { %v1590_v53 = vadd.f32 %v1589_v42, %v1200_v50  ;;  %v1631_v55 = vadd.f32 %v1630_v43, %v1208_v54  ;;  %v1717_v62 = vmul.f32 0.5, %v1588_v56  ;;  %v1719_v2 = vmul.f32 0.5, %v1629_v57 }
 0x3c2   :  { %v1591_v44 = vpop.f32.mrf.mxu0  ;;  %v1632_v45 = vpop.f32.mrf.mxu1 }
 0x3c3   :  { %v1718_v58 = vmul.f32 0.5, %v1590_v53  ;;  %v1720_v60 = vmul.f32 0.5, %v1631_v55 }
 0x3c4   :  { %v1592_v46 = vpop.f32.mrf.mxu0  ;;  %v1633_v47 = vpop.f32.mrf.mxu1 }
 0x3c5   :  { %2667 = vtanh.f32 %v1718_v58 }
 0x3c6   :  { %2669 = vtanh.f32 %v1720_v60 }
 0x3c7   :  { %2671 = vtanh.f32 %v1717_v62 }
 0x3c8   :  { %2673 = vtanh.f32 %v1719_v2 }
 0x3d2   :  { %v2668_v20 = vpop.eup %2667 }
 0x3d3   :  { %v2670_v22 = vpop.eup %2669  ;;  %v1734_v26 = vmul.f32 0.5, %v2668_v20 }
 0x3d4   :  { %v2672_v23 = vpop.eup %2671  ;;  %v1736_v39 = vmul.f32 0.5, %v2670_v22 }
 0x3d5   :  { %v2674_v25 = vpop.eup %2673  ;;  %v1733_v27 = vmul.f32 0.5, %v2672_v23  ;;  %v1742_v29 = vadd.f32 0.5, %v1734_v26 }
 0x3d6   :  { %v1735_v28 = vmul.f32 0.5, %v2674_v25  ;;  %v1744_v31 = vadd.f32 0.5, %v1736_v39 }
 0x3d7   :  { %v1741_v33 = vadd.f32 0.5, %v1733_v27 }
 0x3d8   :  { %v1743_v34 = vadd.f32 0.5, %v1735_v28 }
 0x3d9   :  { %v2290_v40 = vpack.c.bf16 %v1742_v29, %v1741_v33 }
 0x3da   :  { %v2291_v42 = vpack.c.bf16 %v1744_v31, %v1743_v34 }
 0x3db   :  { %v1775_v48 = vrot.slane %v2290_v40, %v2956_v35 }
 0x3dc   :  { %v1782_v41 = vrot.slane %v2291_v42, %v2956_v35 }
 0x3de   :  { %v1669_v8 = vpop.f32.mrf.mxu0  ;;  %v1710_v9 = vpop.f32.mrf.mxu1  ;;  %v1797_v60 = vcombine.low %v1775_v48, %v1782_v41 }
 0x3df   :  { %v1670_v10 = vadd.f32 %v1669_v8, %v1212_v59  ;;  %v1711_v24 = vadd.f32 %v1710_v9, %v1220_v5 }
 0x3e0   :  { %v1671_v11 = vpop.f32.mrf.mxu0  ;;  %v1712_v12 = vpop.f32.mrf.mxu1  ;;  %v1805_v49 = vrot.slane %v1797_v60, %v2956_v35 }
 0x3e1   :  { %v1721_v13 = vmul.f32 0.5, %v1670_v10  ;;  %v1723_v15 = vmul.f32 0.5, %v1711_v24  ;;  %v1672_v16 = vadd.f32 %v1671_v11, %v1216_v6  ;;  %v1713_v61 = vadd.f32 %v1712_v12, %v1224_v7 }
 0x3e2   :  { %v1673_v18 = vpop.f32.mrf.mxu0  ;;  %v1714_v19 = vpop.f32.mrf.mxu1 }
 0x3e3   :  { %2675 = vtanh.f32 %v1721_v13  ;;  %v1722_v30 = vmul.f32 0.5, %v1672_v16  ;;  %v1724_v21 = vmul.f32 0.5, %v1713_v61 }
 0x3e4   :  { %2677 = vtanh.f32 %v1723_v15  ;;  %v1674_v14 = vpop.f32.mrf.mxu0  ;;  %v1715_v17 = vpop.f32.mrf.mxu1 }
 0x3e5   :  { %2679 = vtanh.f32 %v1722_v30 }
 0x3e6   :  { %2681 = vtanh.f32 %v1724_v21 }
 0x3f0   :  { %v2676_v32 = vpop.eup %2675 }
 0x3f1   :  { %v2678_v36 = vpop.eup %2677  ;;  %v1737_v37 = vmul.f32 0.5, %v2676_v32 }
 0x3f2   :  { %v2680_v38 = vpop.eup %2679  ;;  %v1739_v43 = vmul.f32 0.5, %v2678_v36 }
 0x3f3   :  { %v2682_v44 = vpop.eup %2681  ;;  %v1738_v45 = vmul.f32 0.5, %v2680_v38  ;;  %v1745_v47 = vadd.f32 0.5, %v1737_v37 }
 0x3f4   :  { %v1740_v46 = vmul.f32 0.5, %v2682_v44  ;;  %v1747_v50 = vadd.f32 0.5, %v1739_v43 }
 0x3f5   :  { %v1746_v3 = vadd.f32 0.5, %v1738_v45 }
 0x3f6   :  { %v1748_v54 = vadd.f32 0.5, %v1740_v46 }
 0x3f7   :  { %v2292_v51 = vpack.c.bf16 %v1746_v3, %v1745_v47  ;;  %v2098_v52 = vpop.f32.mrf.mxu1 }
 0x3f8   :  { %v2293_v53 = vpack.c.bf16 %v1748_v54, %v1747_v50 }
 0x3f9   :  { %v1789_v55 = vrot.slane %v2292_v51, %v2956_v35  ;;  %v2548_v56 = vpop.f32.mrf.mxu1 }
 0x3fa   :  { %v1796_v57 = vrot.slane %v2293_v53, %v2956_v35  ;;  %v2027_v58 = vpop.f32.mrf.mxu0 }
 0x3fb   :  { %v2031_v62 = vadd.f32 %v2027_v58, %v3004_v63 }
 0x3fc   :  { %v2521_v0 = vpop.f32.mrf.mxu0  ;;  %v1798_v1 = vcombine.low %v1789_v55, %v1796_v57 }
 0x3fd   :  { %v2102_v2 = vadd.f32 %v2098_v52, %v2031_v62 }
 0x3fe   :  { %v1812_v4 = vrot.slane %v1798_v1, %v2956_v35 }
 0x3ff   :  { %2103 = vst [vmem:[#allocation14] sm:$0x3] %v2102_v2 }
 0x400   :  { %v1813_v59 = vcombine.low %v1805_v49, %v1812_v4 }
 0x401   :  { %2814 = shalt.err (!%p2811_p6)
}
 0x402   :  { %2123 = dma.vmem_to_hbm [thread:$0]  %s2121_s1, 32, %s3174_s11, [#allocation15]   ;;  %1815 = vst [vmem:[#allocation13] sm:$0xff] %v1813_v59 }
 0x403   :  { %s2823_s18 = scalar_lea.vmem %s2111_s15, 128  ;;  %p2828_p8 = scmp.lt.s32.totalorder %s2111_s15, %s2111_s15 }
 0x404   :  { %p2824_p7 = scmp.ne.s32.totalorder %s2111_s15, %s2823_s18  ;;  %p2829_p9 = scmp.lt.s32.totalorder %s2823_s18, %s2823_s18 }
 0x406   :  { %p2830_p10 = por %p2829_p9, %p2828_p8 }
 0x408   :  { %p2831_p11 = pnand %p2830_p10, %p2824_p7 }
 0x40a   :  { %2834 = shalt.err (!%p2831_p11)
}
 0x40b   :  { %2113 = dma.vmem_to_hbm [thread:$0]  %s2111_s15, 128, %s3173_s10, [#allocation4]  }
 0x40c   :  { %2851 = dma.done.wait [#allocation4], 128  }
 0x40d   :  { %2852 = vsyncadd [#allocation4], 4294967168 }
 0x40e   :  { %2853 = dma.done.wait [#allocation15], 32  }
 0x40f   :  { %2854 = vsyncadd [#allocation15], 4294967264 }
 0x410   :  { %2130 = vsyncpa [#allocation3], 1 }
 0x411   :  { %2131 = vsyncpa [#allocation6], 1 }
 0x412   :  { %2132 = vsyncpa [#allocation9], 1 }
 0x413   :  { %2133 = vsyncpa [#allocation12], 1 }
 0x414   :  { %2134 = vsyncpa [#allocation4], 1 }
 0x415   :  { %2135 = vsyncpa [#allocation15], 1 }

</bundles_post_ra>
